<compile_context>
chip_gen: v7x
topology: tpu7x:2x2x1
jax: 0.10.0
libtpu: 0.0.40
codegen_flags: <defaults>
</compile_context>

<pallas_src>
import functools

import jax
import jax.numpy as jnp
from jax.experimental import pallas as pl
from jax.experimental.pallas import tpu as pltpu


# ----------------------------------------------------------------------------
# The single fused kernel
# ----------------------------------------------------------------------------
def _fused_forward_kernel(p1_ref, goal_ref, w1_ref, b1_ref, w2_ref, b2_ref,
                          w3_ref, b3_ref, wh1_ref, bh1_ref, wh2_ref, bh2_ref,
                          o_ref, h1_s, p2_s, h2_s, x2_s, xh_s,
                          *, batch, n_q, n_k, c1, c2, num_actions):
    """conv1 + conv2 + conv3 + fused dueling head, all intermediates in VMEM.

    p1:  (n_k*n_q*batch, 192) conv1 im2col patches, duplicated per conv2 kernel
         position; rows ordered (conv2-kernel-pos k, conv2-out-pos q, batch b).
    goal:(batch, c2) goal zero-padded to c2 lanes (first 3 lanes valid).
    wh1: (2*c2, 1024) fused head first layer: rows [0:c2) conv-feature weights,
         rows [c2:c2+3) goal weights, rest zero; columns [adv(512) | val(512)].
    wh2: (1024, A+1) block-diagonal [w2_adv ; w2_val].
    """
    f32 = jnp.float32
    bf16 = jnp.bfloat16
    n_patch = n_q * batch                      # rows of the conv2 im2col matrix

    # ---- conv1: one (n_k*n_patch, 192) @ (192, c1) matmul, bias+ReLU in f32 --
    h1 = jnp.dot(p1_ref[...], w1_ref[...], preferred_element_type=f32)
    h1 = jnp.maximum(h1 + b1_ref[...], 0.0)
    h1_s[...] = h1.astype(bf16)

    # ---- conv2 im2col assembled in VMEM (no HBM round trip for h1) -----------
    # Rows for conv2-kernel-position k are the contiguous block k of h1.
    for k in range(n_k):                                        # static unroll
        p2_s[:, k * c1:(k + 1) * c1] = h1_s[k * n_patch:(k + 1) * n_patch, :]

    # ---- conv2: one (n_patch, n_k*c1) @ (n_k*c1, c2) matmul ------------------
    h2 = jnp.dot(p2_s[...], w2_ref[...], preferred_element_type=f32)
    h2 = jnp.maximum(h2 + b2_ref[...], 0.0)
    h2_s[...] = h2.astype(bf16)

    # ---- conv3: 3x3 kernel covers the whole conv2 map -> single matmul -------
    # Flatten (q, b, c) -> row b, columns (q, c) to match the (n_q*c2, c2) weight.
    for q in range(n_q):                                        # static unroll
        x2_s[:, q * c2:(q + 1) * c2] = h2_s[q * batch:(q + 1) * batch, :]
    x3 = jnp.dot(x2_s[...], w3_ref[...], preferred_element_type=f32)
    x3 = jnp.maximum(x3 + b3_ref[...], 0.0)

    # ---- fused dueling head: [conv feat | goal | 0] @ [w_adv | w_val] --------
    xh_s[:, 0:c2] = x3.astype(bf16)
    xh_s[:, c2:2 * c2] = goal_ref[...]
    h = jnp.dot(xh_s[...], wh1_ref[...], preferred_element_type=f32)
    h = jnp.maximum(h + bh1_ref[...], 0.0).astype(bf16)          # (B, 1024)
    out = jnp.dot(h, wh2_ref[...], preferred_element_type=f32) + bh2_ref[...]

    adv = out[:, :num_actions]                                   # (B, A)
    val = out[:, num_actions:num_actions + 1]                    # (B, 1)
    o_ref[...] = (val + adv - jnp.mean(adv, axis=1, keepdims=True)
                  ).astype(o_ref.dtype)


def _vmem_spec():
    return pl.BlockSpec(memory_space=pltpu.MemorySpace.VMEM)


def fused_forward_call(p1_dup, goal_pad, fp, *, batch, n_q, n_k, c1, c2):
    num_actions = fp["w2h"].shape[1] - 1
    hid = fp["w1h"].shape[1]
    n_patch = n_q * batch
    args = (p1_dup, goal_pad, fp["w_c1"], fp["b_c1"], fp["w_c2"], fp["b_c2"],
            fp["w_c3"], fp["b_c3"], fp["w1h"], fp["b1h"], fp["w2h"], fp["b2h"])

    flops = 2 * (p1_dup.shape[0] * p1_dup.shape[1] * c1
                 + n_patch * (n_k * c1) * c2
                 + batch * (n_q * c2) * c2
                 + batch * fp["w1h"].shape[0] * hid
                 + batch * hid * (num_actions + 1))
    bytes_accessed = (sum(int(a.size) * a.dtype.itemsize for a in args)
                      + batch * num_actions * 4)

    kernel = functools.partial(
        _fused_forward_kernel, batch=batch, n_q=n_q, n_k=n_k, c1=c1, c2=c2,
        num_actions=num_actions)

    return pl.pallas_call(
        kernel,
        out_shape=jax.ShapeDtypeStruct((batch, num_actions), jnp.float32),
        in_specs=[_vmem_spec()] * len(args),
        out_specs=_vmem_spec(),
        scratch_shapes=[
            pltpu.VMEM((n_k * n_patch, c1), jnp.bfloat16),   # conv1 output
            pltpu.VMEM((n_patch, n_k * c1), jnp.bfloat16),   # conv2 im2col patches
            pltpu.VMEM((n_patch, c2), jnp.bfloat16),         # conv2 output
            pltpu.VMEM((batch, n_q * c2), jnp.bfloat16),     # conv3 input (flat)
            pltpu.VMEM((batch, 2 * c2), jnp.bfloat16),       # head input [feat|goal]
        ],
        cost_estimate=pl.CostEstimate(flops=flops, transcendentals=0,
                                      bytes_accessed=bytes_accessed),
    )(*args)


# ----------------------------------------------------------------------------
# Parameters
# ----------------------------------------------------------------------------
def init_params(key, input_shape, num_actions):
    C, H, W = input_shape
    ks = jax.random.split(key, 14)

    def dense_init(k, shape, fan_in):
        return jax.random.normal(k, shape, jnp.float32) / jnp.sqrt(fan_in)

    p = {}
    # conv stack: Conv(C->32,k8,s4), Conv(32->64,k4,s2), Conv(64->64,k3,s1)
    p["w_c1"] = dense_init(ks[0], (32, C, 8, 8), C * 64)
    p["b_c1"] = dense_init(ks[1], (32,), C * 64)
    p["w_c2"] = dense_init(ks[2], (64, 32, 4, 4), 32 * 16)
    p["b_c2"] = dense_init(ks[3], (64,), 32 * 16)
    p["w_c3"] = dense_init(ks[4], (64, 64, 3, 3), 64 * 9)
    p["b_c3"] = dense_init(ks[5], (64,), 64 * 9)

    h1 = (H - 8) // 4 + 1
    w1 = (W - 8) // 4 + 1
    h2 = (h1 - 4) // 2 + 1
    w2 = (w1 - 4) // 2 + 1
    h3 = h2 - 2
    w3 = w2 - 2
    conv_out_size = 64 * h3 * w3
    fc_in = conv_out_size + 3

    p["w1a"] = dense_init(ks[6], (fc_in, 512), fc_in)
    p["b1a"] = dense_init(ks[7], (512,), fc_in)
    p["w2a"] = dense_init(ks[8], (512, num_actions), 512)
    p["b2a"] = dense_init(ks[9], (num_actions,), 512)
    p["w1v"] = dense_init(ks[10], (fc_in, 512), fc_in)
    p["b1v"] = dense_init(ks[11], (512,), fc_in)
    p["w2v"] = dense_init(ks[12], (512, 1), 512)
    p["b2v"] = dense_init(ks[13], (1,), 512)
    return p


def prepare_fused_params(p, num_actions):
    """One-time reshuffle of PyTorch-layout weights into kernel-ready layouts."""
    bf16, f32 = jnp.bfloat16, jnp.float32

    # conv1: (O=32, I, 8, 8) -> (I*8*8, 32); rows ordered (c, kh, kw) to match
    # the im2col built straight from NCHW.  No output-channel padding anymore.
    w1 = p["w_c1"].reshape(p["w_c1"].shape[0], -1).T.astype(bf16)      # (192, 32)
    b1 = p["b_c1"].reshape(1, -1).astype(f32)

    # conv2: (64, 32, 4, 4) -> rows ordered (i, j, c_in) -> (512, 64)
    w2 = jnp.transpose(p["w_c2"], (2, 3, 1, 0)).reshape(-1, 64).astype(bf16)
    b2 = p["b_c2"].reshape(1, -1).astype(f32)

    # conv3: (64, 64, 3, 3) -> rows ordered (kh, kw, c_in) -> (576, 64)
    w3 = jnp.transpose(p["w_c3"], (2, 3, 1, 0)).reshape(-1, 64).astype(bf16)
    b3 = p["b_c3"].reshape(1, -1).astype(f32)

    # fused dueling head, first layer: columns [adv(512) | val(512)], rows are
    # the (conv_feat + goal) input padded to 128 (rows 67..127 are zero).
    fc_in = p["w1a"].shape[0]                                          # 67
    w1cat = jnp.concatenate([p["w1a"], p["w1v"]], axis=1)              # (67, 1024)
    w1h = jnp.zeros((128, w1cat.shape[1]), f32).at[:fc_in, :].set(w1cat)
    w1h = w1h.astype(bf16)
    b1h = jnp.concatenate([p["b1a"], p["b1v"]]).reshape(1, -1).astype(f32)

    # second layer: block diagonal so adv and val come out of one matmul.
    hid = p["w2a"].shape[0]                                            # 512
    a = num_actions
    w2h = jnp.zeros((2 * hid, a + 1), f32)
    w2h = w2h.at[:hid, :a].set(p["w2a"])
    w2h = w2h.at[hid:, a:].set(p["w2v"])
    w2h = w2h.astype(bf16)                                             # (1024, A+1)
    b2h = jnp.concatenate([p["b2a"], p["b2v"]]).reshape(1, -1).astype(f32)

    return dict(w_c1=w1, b_c1=b1, w_c2=w2, b_c2=b2, w_c3=w3, b_c3=b3,
                w1h=w1h, b1h=b1h, w2h=w2h, b2h=b2h)


# ----------------------------------------------------------------------------
# Forward pass
# ----------------------------------------------------------------------------
@jax.jit
def dueling_dqn_forward(fused, state_and_goal):
    # state_and_goal: (B, C_total, H, W) NCHW float32 (PyTorch layout).
    B, _, H, W = state_and_goal.shape
    c_in = 3
    oh1 = (H - 8) // 4 + 1
    ow1 = (W - 8) // 4 + 1
    oh2 = (oh1 - 4) // 2 + 1
    ow2 = (ow1 - 4) // 2 + 1
    # TODO(synk): the fused single-kernel path assumes conv3's 3x3 kernel covers
    # the whole conv2 map (oh2 == ow2 == 3, i.e. 36x36 input); other input sizes
    # need a gridded / un-fused tail path.
    assert (oh2, ow2) == (3, 3), "fused kernel requires a 3x3 conv2 output map"

    state = state_and_goal[:, 0:c_in, :, :].astype(jnp.bfloat16)       # NCHW
    goal = state_and_goal[:, -1, 0, :3]                                # (B, 3)
    goal_pad = (jnp.zeros((B, 64), jnp.float32).at[:, :3].set(goal)
                ).astype(jnp.bfloat16)                                 # (B, 64)

    # conv1 im2col straight from NCHW (folds the NCHW->NHWC transpose into the
    # gather); columns ordered (c, kh, kw) to match fused["w_c1"] rows.
    slabs = []
    for kh in range(8):
        for kw in range(8):
            slabs.append(state[:, :, kh:kh + 4 * oh1:4, kw:kw + 4 * ow1:4])
    p1 = jnp.stack(slabs, axis=-1)                  # (B, 3, 8, 8, 64)
    p1 = p1.transpose(0, 2, 3, 1, 4)                # (B, 8, 8, 3, 64)
    p1 = p1.reshape(B, oh1, ow1, c_in * 64)         # cols (c, kh, kw)

    # Duplicate conv1 patches per conv2 kernel position so the kernel's conv2
    # im2col is just 16 contiguous row-block copies inside VMEM.
    # Rows ordered (conv2-kernel-pos k, conv2-out-pos q, batch b).
    blocks = []
    for i in range(4):
        for j in range(4):
            blocks.append(p1[:, i:i + 2 * oh2:2, j:j + 2 * ow2:2, :])  # (B,3,3,192)
    p1_dup = jnp.stack(blocks, axis=0)              # (16, B, 3, 3, 192)
    p1_dup = p1_dup.transpose(0, 2, 3, 1, 4)        # (16, 3, 3, B, 192)
    p1_dup = p1_dup.reshape(16 * oh2 * ow2 * B, c_in * 64)             # (288, 192)

    return fused_forward_call(p1_dup, goal_pad, fused,
                              batch=B, n_q=oh2 * ow2, n_k=16, c1=32, c2=64)


# ----------------------------------------------------------------------------
# Pure-JAX reference (mirrors the kernel's bf16-operand / f32-accumulate math)
# ----------------------------------------------------------------------------
def reference_forward(params, state_and_goal):
    bf16, f32 = jnp.bfloat16, jnp.float32
    state = state_and_goal[:, 0:3, :, :].astype(bf16)
    goal = state_and_goal[:, -1, 0, :3].astype(bf16)

    def conv(x, w, b, s):
        y = jax.lax.conv_general_dilated(
            x, w.astype(bf16), (s, s), "VALID",
            dimension_numbers=("NCHW", "OIHW", "NCHW"),
            preferred_element_type=f32)
        return jnp.maximum(y + b[None, :, None, None], 0.0).astype(bf16)

    x = conv(state, params["w_c1"], params["b_c1"], 4)
    x = conv(x, params["w_c2"], params["b_c2"], 2)
    x = conv(x, params["w_c3"], params["b_c3"], 1)
    B = x.shape[0]
    x = jnp.concatenate([x.reshape(B, -1), goal], axis=1)

    def dense(a, w, b):
        return jnp.dot(a.astype(bf16), w.astype(bf16), preferred_element_type=f32) + b

    ha = jnp.maximum(dense(x, params["w1a"], params["b1a"]), 0.0).astype(bf16)
    adv = dense(ha, params["w2a"], params["b2a"])
    hv = jnp.maximum(dense(x, params["w1v"], params["b1v"]), 0.0).astype(bf16)
    val = dense(hv, params["w2v"], params["b2v"])
    return val + adv - jnp.mean(adv, axis=1, keepdims=True)


if __name__ == "__main__":
    B = 2
    H = W = 36                       # smallest spatial size the 3-conv stack supports
    num_actions = 6
    input_shape = (3, H, W)          # conv input channels = 3 (as in torch forward)
    total_channels = 4               # 3 state channels + 1 goal channel

    key = jax.random.PRNGKey(0)
    k_params, k_input = jax.random.split(key)
    params = init_params(k_params, input_shape, num_actions)
    fused = prepare_fused_params(params, num_actions)
    state_and_goal = jax.random.normal(
        k_input, (B, total_channels, H, W), jnp.float32)

    out = jax.block_until_ready(dueling_dqn_forward(fused, state_and_goal))
    ref = jax.block_until_ready(reference_forward(params, state_and_goal))

    assert out.shape == (B, num_actions)
    max_diff = float(jnp.max(jnp.abs(out - ref)))
    assert jnp.allclose(out, ref, atol=1e-2, rtol=1e-2), (
        f"mismatch vs reference, max abs diff = {max_diff}")

    print("KERNEL_OK")
</pallas_src>

<mosaic_0001>
module attributes {stable_mosaic.version = 11 : i64} {
  func.func @_fused_forward_kernel(%arg0: memref<288x192xbf16, #tpu.memory_space<vmem>>, %arg1: memref<2x64xbf16, #tpu.memory_space<vmem>>, %arg2: memref<192x32xbf16, #tpu.memory_space<vmem>>, %arg3: memref<1x32xf32, #tpu.memory_space<vmem>>, %arg4: memref<512x64xbf16, #tpu.memory_space<vmem>>, %arg5: memref<1x64xf32, #tpu.memory_space<vmem>>, %arg6: memref<576x64xbf16, #tpu.memory_space<vmem>>, %arg7: memref<1x64xf32, #tpu.memory_space<vmem>>, %arg8: memref<128x1024xbf16, #tpu.memory_space<vmem>>, %arg9: memref<1x1024xf32, #tpu.memory_space<vmem>>, %arg10: memref<1024x7xbf16, #tpu.memory_space<vmem>>, %arg11: memref<1x7xf32, #tpu.memory_space<vmem>>, %arg12: memref<2x6xf32, #tpu.memory_space<vmem>>, %arg13: memref<288x32xbf16, #tpu.memory_space<vmem>>, %arg14: memref<18x512xbf16, #tpu.memory_space<vmem>>, %arg15: memref<18x64xbf16, #tpu.memory_space<vmem>>, %arg16: memref<2x576xbf16, #tpu.memory_space<vmem>>, %arg17: memref<2x128xbf16, #tpu.memory_space<vmem>>) attributes {dimension_semantics = [], scalar_prefetch = 0 : i64, scratch_operands = 5 : i64, tpu.core_type = #tpu.core_type<tc>} {
    %c0 = arith.constant 0 : index
    %c0_0 = arith.constant 0 : index
    %0 = vector.load %arg0[%c0, %c0_0] : memref<288x192xbf16, #tpu.memory_space<vmem>>, vector<288x192xbf16>
    %c0_1 = arith.constant 0 : index
    %c0_2 = arith.constant 0 : index
    %1 = vector.load %arg2[%c0_1, %c0_2] : memref<192x32xbf16, #tpu.memory_space<vmem>>, vector<192x32xbf16>
    %cst = arith.constant dense<0.000000e+00> : vector<288x32xf32>
    %2 = tpu.matmul %0, %1, %cst {dimension_numbers = #tpu.dot_dimension_numbers<[1], [0], [0], [1], [0, 0, 1, 1], [], []>} : vector<288x192xbf16>, vector<192x32xbf16>, vector<288x32xf32> -> vector<288x32xf32>
    %c0_3 = arith.constant 0 : index
    %c0_4 = arith.constant 0 : index
    %3 = vector.load %arg3[%c0_3, %c0_4] : memref<1x32xf32, #tpu.memory_space<vmem>>, vector<1x32xf32>
    %4 = vector.broadcast %3 : vector<1x32xf32> to vector<288x32xf32>
    %5 = arith.addf %2, %4 : vector<288x32xf32>
    %cst_5 = arith.constant 0.000000e+00 : f32
    %6 = vector.broadcast %cst_5 : f32 to vector<288x32xf32>
    %7 = arith.maximumf %5, %6 : vector<288x32xf32>
    %8 = arith.truncf %7 : vector<288x32xf32> to vector<288x32xbf16>
    %c0_6 = arith.constant 0 : index
    %c0_7 = arith.constant 0 : index
    %9 = vector.load %arg13[%c0_6, %c0_7] : memref<288x32xbf16, #tpu.memory_space<vmem>>, vector<288x32xbf16>
    tpu.vector_store %arg13[%c0_6, %c0_7], %8 {strides = array<i32>} : memref<288x32xbf16, #tpu.memory_space<vmem>>, vector<288x32xbf16>,
    %c0_8 = arith.constant 0 : index
    %c0_9 = arith.constant 0 : index
    %10 = vector.load %arg13[%c0_8, %c0_9] : memref<288x32xbf16, #tpu.memory_space<vmem>>, vector<18x32xbf16>
    %c0_10 = arith.constant 0 : index
    %c0_11 = arith.constant 0 : index
    %11 = vector.load %arg14[%c0_10, %c0_11] : memref<18x512xbf16, #tpu.memory_space<vmem>>, vector<18x32xbf16>
    tpu.vector_store %arg14[%c0_10, %c0_11], %10 {strides = array<i32>} : memref<18x512xbf16, #tpu.memory_space<vmem>>, vector<18x32xbf16>,
    %c18 = arith.constant 18 : index
    %c0_12 = arith.constant 0 : index
    %12 = vector.load %arg13[%c18, %c0_12] : memref<288x32xbf16, #tpu.memory_space<vmem>>, vector<18x32xbf16>
    %c0_13 = arith.constant 0 : index
    %c32 = arith.constant 32 : index
    %13 = vector.load %arg14[%c0_13, %c32] : memref<18x512xbf16, #tpu.memory_space<vmem>>, vector<18x32xbf16>
    tpu.vector_store %arg14[%c0_13, %c32], %12 {strides = array<i32>} : memref<18x512xbf16, #tpu.memory_space<vmem>>, vector<18x32xbf16>,
    %c36 = arith.constant 36 : index
    %c0_14 = arith.constant 0 : index
    %14 = vector.load %arg13[%c36, %c0_14] : memref<288x32xbf16, #tpu.memory_space<vmem>>, vector<18x32xbf16>
    %c0_15 = arith.constant 0 : index
    %c64 = arith.constant 64 : index
    %15 = vector.load %arg14[%c0_15, %c64] : memref<18x512xbf16, #tpu.memory_space<vmem>>, vector<18x32xbf16>
    tpu.vector_store %arg14[%c0_15, %c64], %14 {strides = array<i32>} : memref<18x512xbf16, #tpu.memory_space<vmem>>, vector<18x32xbf16>,
    %c54 = arith.constant 54 : index
    %c0_16 = arith.constant 0 : index
    %16 = vector.load %arg13[%c54, %c0_16] : memref<288x32xbf16, #tpu.memory_space<vmem>>, vector<18x32xbf16>
    %c0_17 = arith.constant 0 : index
    %c96 = arith.constant 96 : index
    %17 = vector.load %arg14[%c0_17, %c96] : memref<18x512xbf16, #tpu.memory_space<vmem>>, vector<18x32xbf16>
    tpu.vector_store %arg14[%c0_17, %c96], %16 {strides = array<i32>} : memref<18x512xbf16, #tpu.memory_space<vmem>>, vector<18x32xbf16>,
    %c72 = arith.constant 72 : index
    %c0_18 = arith.constant 0 : index
    %18 = vector.load %arg13[%c72, %c0_18] : memref<288x32xbf16, #tpu.memory_space<vmem>>, vector<18x32xbf16>
    %c0_19 = arith.constant 0 : index
    %c128 = arith.constant 128 : index
    %19 = vector.load %arg14[%c0_19, %c128] : memref<18x512xbf16, #tpu.memory_space<vmem>>, vector<18x32xbf16>
    tpu.vector_store %arg14[%c0_19, %c128], %18 {strides = array<i32>} : memref<18x512xbf16, #tpu.memory_space<vmem>>, vector<18x32xbf16>,
    %c90 = arith.constant 90 : index
    %c0_20 = arith.constant 0 : index
    %20 = vector.load %arg13[%c90, %c0_20] : memref<288x32xbf16, #tpu.memory_space<vmem>>, vector<18x32xbf16>
    %c0_21 = arith.constant 0 : index
    %c160 = arith.constant 160 : index
    %21 = vector.load %arg14[%c0_21, %c160] : memref<18x512xbf16, #tpu.memory_space<vmem>>, vector<18x32xbf16>
    tpu.vector_store %arg14[%c0_21, %c160], %20 {strides = array<i32>} : memref<18x512xbf16, #tpu.memory_space<vmem>>, vector<18x32xbf16>,
    %c108 = arith.constant 108 : index
    %c0_22 = arith.constant 0 : index
    %22 = vector.load %arg13[%c108, %c0_22] : memref<288x32xbf16, #tpu.memory_space<vmem>>, vector<18x32xbf16>
    %c0_23 = arith.constant 0 : index
    %c192 = arith.constant 192 : index
    %23 = vector.load %arg14[%c0_23, %c192] : memref<18x512xbf16, #tpu.memory_space<vmem>>, vector<18x32xbf16>
    tpu.vector_store %arg14[%c0_23, %c192], %22 {strides = array<i32>} : memref<18x512xbf16, #tpu.memory_space<vmem>>, vector<18x32xbf16>,
    %c126 = arith.constant 126 : index
    %c0_24 = arith.constant 0 : index
    %24 = vector.load %arg13[%c126, %c0_24] : memref<288x32xbf16, #tpu.memory_space<vmem>>, vector<18x32xbf16>
    %c0_25 = arith.constant 0 : index
    %c224 = arith.constant 224 : index
    %25 = vector.load %arg14[%c0_25, %c224] : memref<18x512xbf16, #tpu.memory_space<vmem>>, vector<18x32xbf16>
    tpu.vector_store %arg14[%c0_25, %c224], %24 {strides = array<i32>} : memref<18x512xbf16, #tpu.memory_space<vmem>>, vector<18x32xbf16>,
    %c144 = arith.constant 144 : index
    %c0_26 = arith.constant 0 : index
    %26 = vector.load %arg13[%c144, %c0_26] : memref<288x32xbf16, #tpu.memory_space<vmem>>, vector<18x32xbf16>
    %c0_27 = arith.constant 0 : index
    %c256 = arith.constant 256 : index
    %27 = vector.load %arg14[%c0_27, %c256] : memref<18x512xbf16, #tpu.memory_space<vmem>>, vector<18x32xbf16>
    tpu.vector_store %arg14[%c0_27, %c256], %26 {strides = array<i32>} : memref<18x512xbf16, #tpu.memory_space<vmem>>, vector<18x32xbf16>,
    %c162 = arith.constant 162 : index
    %c0_28 = arith.constant 0 : index
    %28 = vector.load %arg13[%c162, %c0_28] : memref<288x32xbf16, #tpu.memory_space<vmem>>, vector<18x32xbf16>
    %c0_29 = arith.constant 0 : index
    %c288 = arith.constant 288 : index
    %29 = vector.load %arg14[%c0_29, %c288] : memref<18x512xbf16, #tpu.memory_space<vmem>>, vector<18x32xbf16>
    tpu.vector_store %arg14[%c0_29, %c288], %28 {strides = array<i32>} : memref<18x512xbf16, #tpu.memory_space<vmem>>, vector<18x32xbf16>,
    %c180 = arith.constant 180 : index
    %c0_30 = arith.constant 0 : index
    %30 = vector.load %arg13[%c180, %c0_30] : memref<288x32xbf16, #tpu.memory_space<vmem>>, vector<18x32xbf16>
    %c0_31 = arith.constant 0 : index
    %c320 = arith.constant 320 : index
    %31 = vector.load %arg14[%c0_31, %c320] : memref<18x512xbf16, #tpu.memory_space<vmem>>, vector<18x32xbf16>
    tpu.vector_store %arg14[%c0_31, %c320], %30 {strides = array<i32>} : memref<18x512xbf16, #tpu.memory_space<vmem>>, vector<18x32xbf16>,
    %c198 = arith.constant 198 : index
    %c0_32 = arith.constant 0 : index
    %32 = vector.load %arg13[%c198, %c0_32] : memref<288x32xbf16, #tpu.memory_space<vmem>>, vector<18x32xbf16>
    %c0_33 = arith.constant 0 : index
    %c352 = arith.constant 352 : index
    %33 = vector.load %arg14[%c0_33, %c352] : memref<18x512xbf16, #tpu.memory_space<vmem>>, vector<18x32xbf16>
    tpu.vector_store %arg14[%c0_33, %c352], %32 {strides = array<i32>} : memref<18x512xbf16, #tpu.memory_space<vmem>>, vector<18x32xbf16>,
    %c216 = arith.constant 216 : index
    %c0_34 = arith.constant 0 : index
    %34 = vector.load %arg13[%c216, %c0_34] : memref<288x32xbf16, #tpu.memory_space<vmem>>, vector<18x32xbf16>
    %c0_35 = arith.constant 0 : index
    %c384 = arith.constant 384 : index
    %35 = vector.load %arg14[%c0_35, %c384] : memref<18x512xbf16, #tpu.memory_space<vmem>>, vector<18x32xbf16>
    tpu.vector_store %arg14[%c0_35, %c384], %34 {strides = array<i32>} : memref<18x512xbf16, #tpu.memory_space<vmem>>, vector<18x32xbf16>,
    %c234 = arith.constant 234 : index
    %c0_36 = arith.constant 0 : index
    %36 = vector.load %arg13[%c234, %c0_36] : memref<288x32xbf16, #tpu.memory_space<vmem>>, vector<18x32xbf16>
    %c0_37 = arith.constant 0 : index
    %c416 = arith.constant 416 : index
    %37 = vector.load %arg14[%c0_37, %c416] : memref<18x512xbf16, #tpu.memory_space<vmem>>, vector<18x32xbf16>
    tpu.vector_store %arg14[%c0_37, %c416], %36 {strides = array<i32>} : memref<18x512xbf16, #tpu.memory_space<vmem>>, vector<18x32xbf16>,
    %c252 = arith.constant 252 : index
    %c0_38 = arith.constant 0 : index
    %38 = vector.load %arg13[%c252, %c0_38] : memref<288x32xbf16, #tpu.memory_space<vmem>>, vector<18x32xbf16>
    %c0_39 = arith.constant 0 : index
    %c448 = arith.constant 448 : index
    %39 = vector.load %arg14[%c0_39, %c448] : memref<18x512xbf16, #tpu.memory_space<vmem>>, vector<18x32xbf16>
    tpu.vector_store %arg14[%c0_39, %c448], %38 {strides = array<i32>} : memref<18x512xbf16, #tpu.memory_space<vmem>>, vector<18x32xbf16>,
    %c270 = arith.constant 270 : index
    %c0_40 = arith.constant 0 : index
    %40 = vector.load %arg13[%c270, %c0_40] : memref<288x32xbf16, #tpu.memory_space<vmem>>, vector<18x32xbf16>
    %c0_41 = arith.constant 0 : index
    %c480 = arith.constant 480 : index
    %41 = vector.load %arg14[%c0_41, %c480] : memref<18x512xbf16, #tpu.memory_space<vmem>>, vector<18x32xbf16>
    tpu.vector_store %arg14[%c0_41, %c480], %40 {strides = array<i32>} : memref<18x512xbf16, #tpu.memory_space<vmem>>, vector<18x32xbf16>,
    %c0_42 = arith.constant 0 : index
    %c0_43 = arith.constant 0 : index
    %42 = vector.load %arg14[%c0_42, %c0_43] : memref<18x512xbf16, #tpu.memory_space<vmem>>, vector<18x512xbf16>
    %c0_44 = arith.constant 0 : index
    %c0_45 = arith.constant 0 : index
    %43 = vector.load %arg4[%c0_44, %c0_45] : memref<512x64xbf16, #tpu.memory_space<vmem>>, vector<512x64xbf16>
    %cst_46 = arith.constant dense<0.000000e+00> : vector<18x64xf32>
    %44 = tpu.matmul %42, %43, %cst_46 {dimension_numbers = #tpu.dot_dimension_numbers<[1], [0], [0], [1], [0, 0, 1, 1], [], []>} : vector<18x512xbf16>, vector<512x64xbf16>, vector<18x64xf32> -> vector<18x64xf32>
    %c0_47 = arith.constant 0 : index
    %c0_48 = arith.constant 0 : index
    %45 = vector.load %arg5[%c0_47, %c0_48] : memref<1x64xf32, #tpu.memory_space<vmem>>, vector<1x64xf32>
    %46 = vector.broadcast %45 : vector<1x64xf32> to vector<18x64xf32>
    %47 = arith.addf %44, %46 : vector<18x64xf32>
    %cst_49 = arith.constant 0.000000e+00 : f32
    %48 = vector.broadcast %cst_49 : f32 to vector<18x64xf32>
    %49 = arith.maximumf %47, %48 : vector<18x64xf32>
    %50 = arith.truncf %49 : vector<18x64xf32> to vector<18x64xbf16>
    %c0_50 = arith.constant 0 : index
    %c0_51 = arith.constant 0 : index
    %51 = vector.load %arg15[%c0_50, %c0_51] : memref<18x64xbf16, #tpu.memory_space<vmem>>, vector<18x64xbf16>
    tpu.vector_store %arg15[%c0_50, %c0_51], %50 {strides = array<i32>} : memref<18x64xbf16, #tpu.memory_space<vmem>>, vector<18x64xbf16>,
    %c0_52 = arith.constant 0 : index
    %c0_53 = arith.constant 0 : index
    %52 = vector.load %arg15[%c0_52, %c0_53] : memref<18x64xbf16, #tpu.memory_space<vmem>>, vector<2x64xbf16>
    %c0_54 = arith.constant 0 : index
    %c0_55 = arith.constant 0 : index
    %53 = vector.load %arg16[%c0_54, %c0_55] : memref<2x576xbf16, #tpu.memory_space<vmem>>, vector<2x64xbf16>
    tpu.vector_store %arg16[%c0_54, %c0_55], %52 {strides = array<i32>} : memref<2x576xbf16, #tpu.memory_space<vmem>>, vector<2x64xbf16>,
    %c2 = arith.constant 2 : index
    %c0_56 = arith.constant 0 : index
    %54 = vector.load %arg15[%c2, %c0_56] : memref<18x64xbf16, #tpu.memory_space<vmem>>, vector<2x64xbf16>
    %c0_57 = arith.constant 0 : index
    %c64_58 = arith.constant 64 : index
    %55 = vector.load %arg16[%c0_57, %c64_58] : memref<2x576xbf16, #tpu.memory_space<vmem>>, vector<2x64xbf16>
    tpu.vector_store %arg16[%c0_57, %c64_58], %54 {strides = array<i32>} : memref<2x576xbf16, #tpu.memory_space<vmem>>, vector<2x64xbf16>,
    %c4 = arith.constant 4 : index
    %c0_59 = arith.constant 0 : index
    %56 = vector.load %arg15[%c4, %c0_59] : memref<18x64xbf16, #tpu.memory_space<vmem>>, vector<2x64xbf16>
    %c0_60 = arith.constant 0 : index
    %c128_61 = arith.constant 128 : index
    %57 = vector.load %arg16[%c0_60, %c128_61] : memref<2x576xbf16, #tpu.memory_space<vmem>>, vector<2x64xbf16>
    tpu.vector_store %arg16[%c0_60, %c128_61], %56 {strides = array<i32>} : memref<2x576xbf16, #tpu.memory_space<vmem>>, vector<2x64xbf16>,
    %c6 = arith.constant 6 : index
    %c0_62 = arith.constant 0 : index
    %58 = vector.load %arg15[%c6, %c0_62] : memref<18x64xbf16, #tpu.memory_space<vmem>>, vector<2x64xbf16>
    %c0_63 = arith.constant 0 : index
    %c192_64 = arith.constant 192 : index
    %59 = vector.load %arg16[%c0_63, %c192_64] : memref<2x576xbf16, #tpu.memory_space<vmem>>, vector<2x64xbf16>
    tpu.vector_store %arg16[%c0_63, %c192_64], %58 {strides = array<i32>} : memref<2x576xbf16, #tpu.memory_space<vmem>>, vector<2x64xbf16>,
    %c8 = arith.constant 8 : index
    %c0_65 = arith.constant 0 : index
    %60 = vector.load %arg15[%c8, %c0_65] : memref<18x64xbf16, #tpu.memory_space<vmem>>, vector<2x64xbf16>
    %c0_66 = arith.constant 0 : index
    %c256_67 = arith.constant 256 : index
    %61 = vector.load %arg16[%c0_66, %c256_67] : memref<2x576xbf16, #tpu.memory_space<vmem>>, vector<2x64xbf16>
    tpu.vector_store %arg16[%c0_66, %c256_67], %60 {strides = array<i32>} : memref<2x576xbf16, #tpu.memory_space<vmem>>, vector<2x64xbf16>,
    %c10 = arith.constant 10 : index
    %c0_68 = arith.constant 0 : index
    %62 = vector.load %arg15[%c10, %c0_68] : memref<18x64xbf16, #tpu.memory_space<vmem>>, vector<2x64xbf16>
    %c0_69 = arith.constant 0 : index
    %c320_70 = arith.constant 320 : index
    %63 = vector.load %arg16[%c0_69, %c320_70] : memref<2x576xbf16, #tpu.memory_space<vmem>>, vector<2x64xbf16>
    tpu.vector_store %arg16[%c0_69, %c320_70], %62 {strides = array<i32>} : memref<2x576xbf16, #tpu.memory_space<vmem>>, vector<2x64xbf16>,
    %c12 = arith.constant 12 : index
    %c0_71 = arith.constant 0 : index
    %64 = vector.load %arg15[%c12, %c0_71] : memref<18x64xbf16, #tpu.memory_space<vmem>>, vector<2x64xbf16>
    %c0_72 = arith.constant 0 : index
    %c384_73 = arith.constant 384 : index
    %65 = vector.load %arg16[%c0_72, %c384_73] : memref<2x576xbf16, #tpu.memory_space<vmem>>, vector<2x64xbf16>
    tpu.vector_store %arg16[%c0_72, %c384_73], %64 {strides = array<i32>} : memref<2x576xbf16, #tpu.memory_space<vmem>>, vector<2x64xbf16>,
    %c14 = arith.constant 14 : index
    %c0_74 = arith.constant 0 : index
    %66 = vector.load %arg15[%c14, %c0_74] : memref<18x64xbf16, #tpu.memory_space<vmem>>, vector<2x64xbf16>
    %c0_75 = arith.constant 0 : index
    %c448_76 = arith.constant 448 : index
    %67 = vector.load %arg16[%c0_75, %c448_76] : memref<2x576xbf16, #tpu.memory_space<vmem>>, vector<2x64xbf16>
    tpu.vector_store %arg16[%c0_75, %c448_76], %66 {strides = array<i32>} : memref<2x576xbf16, #tpu.memory_space<vmem>>, vector<2x64xbf16>,
    %c16 = arith.constant 16 : index
    %c0_77 = arith.constant 0 : index
    %68 = vector.load %arg15[%c16, %c0_77] : memref<18x64xbf16, #tpu.memory_space<vmem>>, vector<2x64xbf16>
    %c0_78 = arith.constant 0 : index
    %c512 = arith.constant 512 : index
    %69 = vector.load %arg16[%c0_78, %c512] : memref<2x576xbf16, #tpu.memory_space<vmem>>, vector<2x64xbf16>
    tpu.vector_store %arg16[%c0_78, %c512], %68 {strides = array<i32>} : memref<2x576xbf16, #tpu.memory_space<vmem>>, vector<2x64xbf16>,
    %c0_79 = arith.constant 0 : index
    %c0_80 = arith.constant 0 : index
    %70 = vector.load %arg16[%c0_79, %c0_80] : memref<2x576xbf16, #tpu.memory_space<vmem>>, vector<2x576xbf16>
    %c0_81 = arith.constant 0 : index
    %c0_82 = arith.constant 0 : index
    %71 = vector.load %arg6[%c0_81, %c0_82] : memref<576x64xbf16, #tpu.memory_space<vmem>>, vector<576x64xbf16>
    %cst_83 = arith.constant dense<0.000000e+00> : vector<2x64xf32>
    %72 = tpu.matmul %70, %71, %cst_83 {dimension_numbers = #tpu.dot_dimension_numbers<[1], [0], [0], [1], [0, 0, 1, 1], [], []>} : vector<2x576xbf16>, vector<576x64xbf16>, vector<2x64xf32> -> vector<2x64xf32>
    %c0_84 = arith.constant 0 : index
    %c0_85 = arith.constant 0 : index
    %73 = vector.load %arg7[%c0_84, %c0_85] : memref<1x64xf32, #tpu.memory_space<vmem>>, vector<1x64xf32>
    %74 = vector.broadcast %73 : vector<1x64xf32> to vector<2x64xf32>
    %75 = arith.addf %72, %74 : vector<2x64xf32>
    %cst_86 = arith.constant 0.000000e+00 : f32
    %76 = vector.broadcast %cst_86 : f32 to vector<2x64xf32>
    %77 = arith.maximumf %75, %76 : vector<2x64xf32>
    %78 = arith.truncf %77 : vector<2x64xf32> to vector<2x64xbf16>
    %c0_87 = arith.constant 0 : index
    %c0_88 = arith.constant 0 : index
    %79 = vector.load %arg17[%c0_87, %c0_88] : memref<2x128xbf16, #tpu.memory_space<vmem>>, vector<2x64xbf16>
    tpu.vector_store %arg17[%c0_87, %c0_88], %78 {strides = array<i32>} : memref<2x128xbf16, #tpu.memory_space<vmem>>, vector<2x64xbf16>,
    %c0_89 = arith.constant 0 : index
    %c0_90 = arith.constant 0 : index
    %80 = vector.load %arg1[%c0_89, %c0_90] : memref<2x64xbf16, #tpu.memory_space<vmem>>, vector<2x64xbf16>
    %c0_91 = arith.constant 0 : index
    %c64_92 = arith.constant 64 : index
    %81 = vector.load %arg17[%c0_91, %c64_92] : memref<2x128xbf16, #tpu.memory_space<vmem>>, vector<2x64xbf16>
    tpu.vector_store %arg17[%c0_91, %c64_92], %80 {strides = array<i32>} : memref<2x128xbf16, #tpu.memory_space<vmem>>, vector<2x64xbf16>,
    %c0_93 = arith.constant 0 : index
    %c0_94 = arith.constant 0 : index
    %82 = vector.load %arg17[%c0_93, %c0_94] : memref<2x128xbf16, #tpu.memory_space<vmem>>, vector<2x128xbf16>
    %c0_95 = arith.constant 0 : index
    %c0_96 = arith.constant 0 : index
    %83 = vector.load %arg8[%c0_95, %c0_96] : memref<128x1024xbf16, #tpu.memory_space<vmem>>, vector<128x1024xbf16>
    %cst_97 = arith.constant dense<0.000000e+00> : vector<2x1024xf32>
    %84 = tpu.matmul %82, %83, %cst_97 {dimension_numbers = #tpu.dot_dimension_numbers<[1], [0], [0], [1], [0, 0, 1, 1], [], []>} : vector<2x128xbf16>, vector<128x1024xbf16>, vector<2x1024xf32> -> vector<2x1024xf32>
    %c0_98 = arith.constant 0 : index
    %c0_99 = arith.constant 0 : index
    %85 = vector.load %arg9[%c0_98, %c0_99] : memref<1x1024xf32, #tpu.memory_space<vmem>>, vector<1x1024xf32>
    %86 = vector.broadcast %85 : vector<1x1024xf32> to vector<2x1024xf32>
    %87 = arith.addf %84, %86 : vector<2x1024xf32>
    %cst_100 = arith.constant 0.000000e+00 : f32
    %88 = vector.broadcast %cst_100 : f32 to vector<2x1024xf32>
    %89 = arith.maximumf %87, %88 : vector<2x1024xf32>
    %90 = arith.truncf %89 : vector<2x1024xf32> to vector<2x1024xbf16>
    %c0_101 = arith.constant 0 : index
    %c0_102 = arith.constant 0 : index
    %91 = vector.load %arg10[%c0_101, %c0_102] : memref<1024x7xbf16, #tpu.memory_space<vmem>>, vector<1024x7xbf16>
    %cst_103 = arith.constant dense<0.000000e+00> : vector<2x7xf32>
    %92 = tpu.matmul %90, %91, %cst_103 {dimension_numbers = #tpu.dot_dimension_numbers<[1], [0], [0], [1], [0, 0, 1, 1], [], []>} : vector<2x1024xbf16>, vector<1024x7xbf16>, vector<2x7xf32> -> vector<2x7xf32>
    %c0_104 = arith.constant 0 : index
    %c0_105 = arith.constant 0 : index
    %93 = vector.load %arg11[%c0_104, %c0_105] : memref<1x7xf32, #tpu.memory_space<vmem>>, vector<1x7xf32>
    %94 = vector.broadcast %93 : vector<1x7xf32> to vector<2x7xf32>
    %95 = arith.addf %92, %94 : vector<2x7xf32>
    %96 = vector.extract_strided_slice %95 {offsets = [0, 0], sizes = [2, 6], strides = [1, 1]} : vector<2x7xf32> to vector<2x6xf32>
    %97 = vector.extract_strided_slice %95 {offsets = [0, 6], sizes = [2, 1], strides = [1, 1]} : vector<2x7xf32> to vector<2x1xf32>
    %98 = vector.broadcast %97 : vector<2x1xf32> to vector<2x6xf32>
    %99 = arith.addf %98, %96 : vector<2x6xf32>
    %cst_106 = arith.constant dense<0.000000e+00> : vector<2xf32>
    %100 = vector.multi_reduction <add>, %96, %cst_106 [1] : vector<2x6xf32> to vector<2xf32>
    %101 = vector.shape_cast %100 : vector<2xf32> to vector<2x1xf32>
    %cst_107 = arith.constant 6.000000e+00 : f32
    %102 = vector.broadcast %cst_107 : f32 to vector<2x1xf32>
    %103 = arith.divf %101, %102 : vector<2x1xf32>
    %104 = vector.broadcast %103 : vector<2x1xf32> to vector<2x6xf32>
    %105 = arith.subf %99, %104 : vector<2x6xf32>
    %c0_108 = arith.constant 0 : index
    %c0_109 = arith.constant 0 : index
    %106 = vector.load %arg12[%c0_108, %c0_109] : memref<2x6xf32, #tpu.memory_space<vmem>>, vector<2x6xf32>
    tpu.vector_store %arg12[%c0_108, %c0_109], %105 {strides = array<i32>} : memref<2x6xf32, #tpu.memory_space<vmem>>, vector<2x6xf32>,
    return
  }
}

</mosaic_0001>

<bundles_post_ra>
// kernel: dueling_dqn_forward.1
= control target key start
LH: loop header
LB: loop body
LE: loop exit
PB: predicated region body
PF: predicated region fallthrough
CT: control target
= control target key end

     0   :  { %v4264_v1 = vmov 0   ;;  %vm344_vm0 = vcmask 523264   ;;  %s5430_s0 = inlined_call_operand.vmem [shape: bf16[288,192], index: 0, kind: input, shape index: {}]   ;;  %s5431_s1 = inlined_call_operand.vmem [shape: bf16[2,64], index: 1, kind: input, shape index: {}]   ;;  %s5432_s2 = inlined_call_operand.vmem [shape: bf16[192,32], index: 2, kind: input, shape index: {}]   ;;  %s5433_s3 = inlined_call_operand.vmem [shape: f32[1,32], index: 3, kind: input, shape index: {}]   ;;  %s5434_s4 = inlined_call_operand.vmem [shape: bf16[512,64], index: 4, kind: input, shape index: {}]   ;;  %s5435_s5 = inlined_call_operand.vmem [shape: f32[1,64], index: 5, kind: input, shape index: {}]   ;;  %s5436_s6 = inlined_call_operand.vmem [shape: bf16[576,64], index: 6, kind: input, shape index: {}]   ;;  %s5437_s7 = inlined_call_operand.vmem [shape: f32[1,64], index: 7, kind: input, shape index: {}]   ;;  %s5438_s8 = inlined_call_operand.vmem [shape: bf16[128,1024], index: 8, kind: input, shape index: {}]   ;;  %s5439_s9 = inlined_call_operand.vmem [shape: f32[1,1024], index: 9, kind: input, shape index: {}]   ;;  %s5440_s10 = inlined_call_operand.vmem [shape: bf16[1024,7], index: 10, kind: input, shape index: {}]   ;;  %s5441_s11 = inlined_call_operand.vmem [shape: f32[1,7], index: 11, kind: input, shape index: {}]   ;;  %s5442_s12 = inlined_call_operand.hbm [shape: f32[2,6], index: 12, kind: output, shape index: {}]  }
   0x1   :  { %v3989_v0 = vld [vmem:[%s5432_s2] sm:$0xff]   ;;  %399 = vmatprep.subr.bf16.mxu0 %v4264_v1  ;;  %v3990_v2 = vld [vmem:[%s5432_s2 + $0x8] sm:$0xff]   ;;  %v3991_v3 = vld [vmem:[%s5432_s2 + $0x10] sm:$0xff]  }
   0x2   :  { %400 = vmatpush1.bf16.msra.mxu0 %v3989_v0  ;;  %v3992_v4 = vld [vmem:[%s5432_s2 + $0x18] sm:$0xff]   ;;  %v4003_v5 = vld [vmem:[%s5430_s0 + $0x4] ss:$8 sps:$4 sm:$0xff]   ;;  %v3995_v8 = vld [vmem:[%s5432_s2 + $0x30] sm:$0xff]  }
   0x3   :  { %401 = vmatprep.subr.bf16.mxu0 %v4264_v1  ;;  %v3993_v6 = vld [vmem:[%s5432_s2 + $0x20] sm:$0xff]   ;;  %3476 = vmatprep.mubr.msk.bf16.mxu0 %vm344_vm0, %v4003_v5  ;;  %v3994_v7 = vld [vmem:[%s5432_s2 + $0x28] sm:$0xff]   ;;  %v3996_v9 = vld [vmem:[%s5432_s2 + $0x38] sm:$0xff]  }
   0x4   :  { %v3997_v10 = vld [vmem:[%s5432_s2 + $0x40] sm:$0xff]   ;;  %v3998_v11 = vld [vmem:[%s5432_s2 + $0x48] sm:$0xff]   ;;  %v3999_v12 = vld [vmem:[%s5432_s2 + $0x50] sm:$0xff]  }
   0x5   :  { %v4000_v13 = vld [vmem:[%s5432_s2 + $0x58] sm:$0xff]   ;;  %v4001_v14 = vld [vmem:[%s5430_s0] ss:$8 sps:$4 sm:$0xff]   ;;  %v4007_v17 = vld [vmem:[%s5430_s0 + $0x24] ss:$8 sps:$4 sm:$0xff]  }
   0x6   :  { %402 = vmatpush1.bf16.msra.mxu0 %v3990_v2  ;;  %v4004_v15 = vld [vmem:[%s5430_s0 + $0x14] ss:$8 sps:$4 sm:$0xff]   ;;  %v4006_v16 = vld [vmem:[%s5430_s0 + $0x10] ss:$8 sps:$4 sm:$0xff]   ;;  %v4009_v18 = vld [vmem:[%s5430_s0 + $0x20] ss:$8 sps:$4 sm:$0xff]  }
   0x7   :  { %403 = vmatprep.subr.bf16.mxu0 %v4264_v1  ;;  %v4010_v19 = vld [vmem:[%s5430_s0 + $0x34] ss:$8 sps:$4 sm:$0xff]   ;;  %v4012_v20 = vld [vmem:[%s5430_s0 + $0x30] ss:$8 sps:$4 sm:$0xff]   ;;  %v4013_v21 = vld [vmem:[%s5430_s0 + $0x44] ss:$8 sps:$4 sm:$0xff]  }
   0x8   :  { %v4015_v22 = vld [vmem:[%s5430_s0 + $0x40] ss:$8 sps:$4 sm:$0xff]   ;;  %v4016_v23 = vld [vmem:[%s5430_s0 + $0x54] ss:$8 sps:$4 sm:$0xff]   ;;  %v4018_v24 = vld [vmem:[%s5430_s0 + $0x50] ss:$8 sps:$4 sm:$0xff]  }
   0x9   :  { %v4019_v25 = vld [vmem:[%s5430_s0 + $0x64] ss:$8 sps:$4 sm:$0xff]   ;;  %v4021_v26 = vld [vmem:[%s5430_s0 + $0x60] ss:$8 sps:$4 sm:$0xff]   ;;  %v4022_v27 = vld [vmem:[%s5430_s0 + $0x74] ss:$8 sps:$4 sm:$0xff]  }
   0xa   :  { %404 = vmatpush1.bf16.msra.mxu0 %v3991_v3  ;;  %v4024_v28 = vld [vmem:[%s5430_s0 + $0x70] ss:$8 sps:$4 sm:$0xff]   ;;  %v4025_v29 = vld [vmem:[%s5430_s0 + $0x84] ss:$8 sps:$4 sm:$0xff]   ;;  %v4027_v30 = vld [vmem:[%s5430_s0 + $0x80] ss:$8 sps:$4 sm:$0xff]  }
   0xb   :  { %405 = vmatprep.subr.bf16.mxu0 %v4264_v1  ;;  %v4028_v31 = vld [vmem:[%s5430_s0 + $0x94] ss:$8 sps:$4 sm:$0xff]   ;;  %v4030_v32 = vld [vmem:[%s5430_s0 + $0x90] ss:$8 sps:$4 sm:$0xff]   ;;  %v4031_v33 = vld [vmem:[%s5430_s0 + $0xa4] ss:$8 sps:$4 sm:$0xff]  }
   0xe   :  { %406 = vmatpush1.bf16.msra.mxu0 %v3992_v4 }
   0xf   :  { %407 = vmatprep.subr.bf16.mxu0 %v4264_v1 }
  0x12   :  { %408 = vmatpush1.bf16.msra.mxu0 %v3993_v6 }
  0x13   :  { %409 = vmatprep.subr.bf16.mxu0 %v4264_v1 }
  0x16   :  { %410 = vmatpush1.bf16.msra.mxu0 %v3994_v7 }
  0x17   :  { %411 = vmatprep.subr.bf16.mxu0 %v4264_v1 }
  0x1a   :  { %412 = vmatpush1.bf16.msra.mxu0 %v3995_v8 }
  0x1b   :  { %413 = vmatprep.subr.bf16.mxu0 %v4264_v1 }
  0x1e   :  { %414 = vmatpush1.bf16.msra.mxu0 %v3996_v9 }
  0x1f   :  { %415 = vmatprep.subr.bf16.mxu0 %v4264_v1 }
  0x22   :  { %416 = vmatpush1.bf16.msra.mxu0 %v3997_v10 }
  0x23   :  { %417 = vmatprep.subr.bf16.mxu0 %v4264_v1 }
  0x26   :  { %418 = vmatpush1.bf16.msra.mxu0 %v3998_v11 }
  0x27   :  { %419 = vmatprep.subr.bf16.mxu0 %v4264_v1 }
  0x2a   :  { %420 = vmatpush1.bf16.msra.mxu0 %v3999_v12 }
  0x2b   :  { %421 = vmatprep.subr.bf16.mxu0 %v4264_v1 }
  0x2e   :  { %422 = vmatpush1.bf16.msra.mxu0 %v4000_v13 }
  0x31   :  { %432 = vmatmul.mubr.bf16.vlgmr.msra.gmra.mrb[0].mxu0 %v4001_v14 }
  0x32   :  { %3477 = vmatprep.mubr.msk.bf16.mxu0 %vm344_vm0, %v4004_v15 }
  0x39   :  { %440 = vmatmul.mubr.bf16.gmra.mrb[4].mxu0 %v4006_v16 }
  0x3a   :  { %3478 = vmatprep.mubr.msk.bf16.mxu0 %vm344_vm0, %v4007_v17 }
  0x41   :  { %448 = vmatmul.mubr.bf16.gmra.mrb[8].mxu0 %v4009_v18 }
  0x42   :  { %3479 = vmatprep.mubr.msk.bf16.mxu0 %vm344_vm0, %v4010_v19 }
  0x49   :  { %456 = vmatmul.mubr.bf16.gmra.mrb[12].mxu0 %v4012_v20 }
  0x4a   :  { %3480 = vmatprep.mubr.msk.bf16.mxu0 %vm344_vm0, %v4013_v21 }
  0x51   :  { %464 = vmatmul.mubr.bf16.gmra.mrb[16].mxu0 %v4015_v22 }
  0x52   :  { %3481 = vmatprep.mubr.msk.bf16.mxu0 %vm344_vm0, %v4016_v23 }
  0x59   :  { %472 = vmatmul.mubr.bf16.gmra.mrb[20].mxu0 %v4018_v24 }
  0x5a   :  { %3482 = vmatprep.mubr.msk.bf16.mxu0 %vm344_vm0, %v4019_v25 }
  0x61   :  { %480 = vmatmul.mubr.bf16.gmra.mrb[24].mxu0 %v4021_v26 }
  0x62   :  { %3483 = vmatprep.mubr.msk.bf16.mxu0 %vm344_vm0, %v4022_v27 }
  0x69   :  { %488 = vmatmul.mubr.bf16.gmra.mrb[28].mxu0 %v4024_v28 }
  0x6a   :  { %3484 = vmatprep.mubr.msk.bf16.mxu0 %vm344_vm0, %v4025_v29 }
  0x71   :  { %496 = vmatmul.mubr.bf16.gmra.mrb[32].mxu0 %v4027_v30 }
  0x72   :  { %3485 = vmatprep.mubr.msk.bf16.mxu0 %vm344_vm0, %v4028_v31 }
  0x79   :  { %504 = vmatmul.mubr.bf16.gmra.mrb[36].mxu0 %v4030_v32 }
  0x7a   :  { %3486 = vmatprep.mubr.msk.bf16.mxu0 %vm344_vm0, %v4031_v33 }
  0x7b   :  { %17 = vsyncpa [#allocation8], 0  ;;  %v4033_v34 = vld [vmem:[%s5430_s0 + $0xa0] ss:$8 sps:$4 sm:$0xff]   ;;  %v4034_v35 = vld [vmem:[%s5430_s0 + $0xb4] ss:$8 sps:$4 sm:$0xff]  }
  0x7c   :  { %v4036_v36 = vld [vmem:[%s5430_s0 + $0xb0] ss:$8 sps:$4 sm:$0xff]   ;;  %v4037_v37 = vld [vmem:[%s5430_s0 + $0xc4] ss:$8 sps:$4 sm:$0xff]   ;;  %v4039_v38 = vld [vmem:[%s5430_s0 + $0xc0] ss:$8 sps:$4 sm:$0xff]  }
  0x7d   :  { %v4040_v39 = vld [vmem:[%s5430_s0 + $0xd4] ss:$8 sps:$4 sm:$0xff]   ;;  %v4042_v40 = vld [vmem:[%s5430_s0 + $0xd0] ss:$8 sps:$4 sm:$0xff]   ;;  %v4043_v41 = vld [vmem:[%s5430_s0 + $0xe4] ss:$8 sps:$4 sm:$0xff]  }
  0x7e   :  { %v4045_v42 = vld [vmem:[%s5430_s0 + $0xe0] ss:$8 sps:$4 sm:$0xff]   ;;  %v4046_v43 = vld [vmem:[%s5430_s0 + $0xf4] ss:$8 sps:$4 sm:$0xff]   ;;  %v4048_v44 = vld [vmem:[%s5430_s0 + $0xf0] ss:$8 sps:$4 sm:$0xff]  }
  0x7f   :  { %v4049_v45 = vld [vmem:[%s5430_s0 + $0x104] ss:$8 sps:$4 sm:$0xff]   ;;  %v4051_v46 = vld [vmem:[%s5430_s0 + $0x100] ss:$8 sps:$4 sm:$0xff]   ;;  %v4052_v47 = vld [vmem:[%s5430_s0 + $0x114] ss:$8 sps:$4 sm:$0xff]  }
  0x80   :  { %v4054_v48 = vld [vmem:[%s5430_s0 + $0x110] ss:$8 sps:$4 sm:$0xff]   ;;  %v4516_v49 = vld [vmem:[%s5433_s3] ss:$0 sm:$0xff]  ;;  %vm630_vm1 = vcmask 261120   ;;  %vm662_vm2 = vcmask 257024  }
  0x81   :  { %512 = vmatmul.mubr.bf16.gmra.mrb[40].mxu0 %v4033_v34  ;;  %vm677_vm3 = vcmask 1042432   ;;  %vm678_vm4 = vcmask 1046532   ;;  %vm665_vm5 = vcmask 253952   ;;  %s4265_s0 = smov 32   ;;  %vm712_vm7 = vcmask 1041408   ;;  %s4266_s3 = smov 64  }
  0x82   :  { %3487 = vmatprep.mubr.msk.bf16.mxu0 %vm344_vm0, %v4034_v35  ;;  %vm4530_vm6 = vmor %vm677_vm3, %vm678_vm4  ;;  %vm713_vm8 = vcmask 1045508   ;;  %vm747_vm10 = vcmask 1040384   ;;  %vm748_vm11 = vcmask 1044484   ;;  %s4267_s29 = smov 96   ;;  %vm697_vm13 = vcmask 519424  }
  0x83   :  { %vm4546_vm9 = vmor %vm712_vm7, %vm713_vm8  ;;  %vm732_vm14 = vcmask 781824   ;;  %vm700_vm15 = vcmask 516352   ;;  %vm770_vm3 = vcmask 1041152   ;;  %vm1505_vm4 = vcmask 519168  }
  0x84   :  { %vm4573_vm12 = vmor %vm747_vm10, %vm748_vm11  ;;  %vm4270_vm7 = vmmov 0  }
  0x89   :  { %520 = vmatmul.mubr.bf16.gmra.mrb[44].mxu0 %v4036_v36 }
  0x8a   :  { %3488 = vmatprep.mubr.msk.bf16.mxu0 %vm344_vm0, %v4037_v37 }
  0x91   :  { %528 = vmatmul.mubr.bf16.gmra.mrb[48].mxu0 %v4039_v38 }
  0x92   :  { %3489 = vmatprep.mubr.msk.bf16.mxu0 %vm344_vm0, %v4040_v39 }
  0x99   :  { %536 = vmatmul.mubr.bf16.gmra.mrb[52].mxu0 %v4042_v40 }
  0x9a   :  { %3490 = vmatprep.mubr.msk.bf16.mxu0 %vm344_vm0, %v4043_v41 }
  0xa1   :  { %544 = vmatmul.mubr.bf16.gmra.mrb[56].mxu0 %v4045_v42 }
  0xa2   :  { %3491 = vmatprep.mubr.msk.bf16.mxu0 %vm344_vm0, %v4046_v43 }
  0xa9   :  { %552 = vmatmul.mubr.bf16.gmra.mrb[60].mxu0 %v4048_v44 }
  0xaa   :  { %3492 = vmatprep.mubr.msk.bf16.mxu0 %vm344_vm0, %v4049_v45 }
  0xb1   :  { %560 = vmatmul.mubr.bf16.gmra.mrb[64].mxu0 %v4051_v46 }
  0xb2   :  { %3493 = vmatprep.mubr.msk.bf16.mxu0 %vm344_vm0, %v4052_v47 }
  0xb9   :  { %568 = vmatmul.mubr.bf16.gmra.mrb[68].mxu0 %v4054_v48 }
  0xba   :  { %2613 = vmatprep.mubr.bf16.mxu0 %v4264_v1 }
 0x104   :  { %v433_v50 = vpop.f32.mrb[0].mxu0 }
 0x105   :  { %v434_v51 = vadd.f32 %v4516_v49, %v433_v50  ;;  %v435_v52 = vpop.f32.mrb[1].mxu0 }
 0x106   :  { %v436_v53 = vpop.f32.mrb[2].mxu0 }
 0x107   :  { %v437_v54 = vadd.f32 %v4516_v49, %v436_v53  ;;  %v438_v55 = vpop.f32.mrb[3].mxu0  ;;  %v576_v56 = vmax.f32 %v434_v51, 0.0 }
 0x109   :  { %v577_v57 = vmax.f32 %v437_v54, 0.0 }
 0x10b   :  { %v612_v58 = vpack.c.bf16 %v577_v57, %v576_v56 }
 0x10c   :  { %v441_v59 = vpop.f32.mrb[4].mxu0 }
 0x10d   :  { %631 = vst.msk [vmem:[#allocation2] sm:$0xff] %vm630_vm1, %v612_v58  ;;  %v442_v60 = vadd.f32 %v4516_v49, %v441_v59  ;;  %v443_v61 = vpop.f32.mrb[5].mxu0 }
 0x10e   :  { %v444_v62 = vpop.f32.mrb[6].mxu0 }
 0x10f   :  { %v445_v63 = vadd.f32 %v4516_v49, %v444_v62  ;;  %v446_v0 = vpop.f32.mrb[7].mxu0  ;;  %v578_v2 = vmax.f32 %v442_v60, 0.0 }
 0x111   :  { %v579_v3 = vmax.f32 %v445_v63, 0.0 }
 0x113   :  { %v613_v4 = vpack.c.bf16 %v579_v3, %v578_v2 }
 0x114   :  { %v449_v5 = vpop.f32.mrb[8].mxu0  ;;  %v649_v6 = vld [vmem:[#allocation2] sm:$0xff] }
 0x115   :  { %632 = vst.msk [vmem:[#allocation2 + $0x8] sm:$0xff] %vm630_vm1, %v613_v4  ;;  %v450_v7 = vadd.f32 %v4516_v49, %v449_v5  ;;  %v451_v8 = vpop.f32.mrb[9].mxu0  ;;  %v3494_v9 = vcombine.low %v649_v6, %v649_v6  ;;  %v3495_v10 = vcombine.high %v649_v6, %v649_v6 }
 0x116   :  { %v452_v11 = vpop.f32.mrb[10].mxu0  ;;  %v4091_v8 = vld [vmem:[%s5434_s4 + $0x40] sm:$0xff]  }
 0x117   :  { %v453_v12 = vadd.f32 %v4516_v49, %v452_v11  ;;  %v454_v13 = vpop.f32.mrb[11].mxu0  ;;  %663 = vst.msk [vmem:[#allocation3] sm:$0xf] %vm662_vm2, %v3494_v9  ;;  %664 = vst.msk [vmem:[#allocation3 + $0x10] sm:$0xf] %vm662_vm2, %v3495_v10  ;;  %v580_v14 = vmax.f32 %v450_v7, 0.0  ;;  %3774 = vmatprep.subr.bf16.mxu1 %v4091_v8 }
 0x118   :  { %v4092_v9 = vld [vmem:[%s5434_s4] sm:$0xff]  }
 0x119   :  { %v581_v15 = vmax.f32 %v453_v12, 0.0  ;;  %3775 = vmatpush3.bf16.msra.mxu1 %v4092_v9 }
 0x11b   :  { %v614_v16 = vpack.c.bf16 %v581_v15, %v580_v14 }
 0x11c   :  { %v457_v17 = vpop.f32.mrb[12].mxu0  ;;  %v667_v18 = vld [vmem:[#allocation2 + $0x8] sm:$0xfe]  ;;  %v4090_v23 = vld [vmem:[#allocation2 + $0x8] ss:$0 sps:$4 sm:$0x11]  }
 0x11d   :  { %633 = vst.msk [vmem:[#allocation2 + $0x10] sm:$0xff] %vm630_vm1, %v614_v16  ;;  %v458_v19 = vadd.f32 %v4516_v49, %v457_v17  ;;  %v459_v20 = vpop.f32.mrb[13].mxu0  ;;  %v3497_v21 = vcombine.low %v667_v18, %v667_v18  ;;  %v3498_v22 = vcombine.high %v667_v18, %v667_v18 }
 0x11e   :  { %v460_v24 = vpop.f32.mrb[14].mxu0  ;;  %666 = vst.msk [vmem:[#allocation3 + $0x20] sm:$0x1] %vm665_vm5, %v4090_v23 }
 0x11f   :  { %v461_v26 = vadd.f32 %v4516_v49, %v460_v24  ;;  %v462_v27 = vpop.f32.mrb[15].mxu0  ;;  %v3500_v28 = vrot.slane %v3497_v21, 9  ;;  %v682_v29 = vrot.slane %v3498_v22, 5  ;;  %v582_v30 = vmax.f32 %v458_v19, 0.0 }
 0x121   :  { %v583_v31 = vmax.f32 %v461_v26, 0.0  ;;  %v683_v32 = vsel %vm4530_vm6, %v3500_v28, %v682_v29  ;;  %v684_v40 = vrot.slane %v682_v29, 4 }
 0x122   :  { %688 = vrot.lane.b32.xlu0 %v683_v32, %s4265_s0 }
 0x123   :  { %v615_v33 = vpack.c.bf16 %v583_v31, %v582_v30 }
 0x124   :  { %v465_v34 = vpop.f32.mrb[16].mxu0  ;;  %v4057_v35 = vld [vmem:[#allocation2 + $0x10] ss:$0 sps:$4 sm:$0x33]   ;;  %v702_v38 = vld [vmem:[#allocation2 + $0x10] sm:$0xfc] }
 0x125   :  { %634 = vst.msk [vmem:[#allocation2 + $0x18] sm:$0xff] %vm630_vm1, %v615_v33  ;;  %v466_v36 = vadd.f32 %v4516_v49, %v465_v34  ;;  %v467_v37 = vpop.f32.mrb[17].mxu0  ;;  %v685_v41 = vrot.slane %v4057_v35, 5  ;;  %v3501_v42 = vcombine.low %v702_v38, %v702_v38  ;;  %v3502_v43 = vcombine.high %v702_v38, %v702_v38  ;;  %v4094_v33 = vld [vmem:[%s5434_s4 + $0x48] sm:$0xff]  }
 0x126   :  { %v468_v39 = vpop.f32.mrb[18].mxu0  ;;  %v4095_v34 = vld [vmem:[%s5434_s4 + $0x8] sm:$0xff]   ;;  %3776 = vmatprep.subr.bf16.mxu1 %v4094_v33  ;;  %v4105_v33 = vld [vmem:[%s5434_s4 + $0x70] sm:$0xff]  }
 0x127   :  { %v469_v44 = vadd.f32 %v4516_v49, %v468_v39  ;;  %v470_v45 = vpop.f32.mrb[19].mxu0  ;;  %v686_v46 = vsel %vm4530_vm6, %v684_v40, %v685_v41  ;;  %v3504_v47 = vrot.slane %v3501_v42, 10  ;;  %v717_v48 = vrot.slane %v3502_v43, 6  ;;  %3777 = vmatpush3.bf16.msra.mxu1 %v4095_v34  ;;  %v4097_v43 = vld [vmem:[%s5434_s4 + $0x50] sm:$0xff]  }
 0x128   :  { %v584_v50 = vmax.f32 %v466_v36, 0.0  ;;  %690 = vrot.lane.b32.xlu0 %v686_v46, %s4265_s0  ;;  %v687_v4 = vrot.slane %v685_v41, 4  ;;  %3778 = vmatprep.subr.bf16.mxu1 %v4097_v43  ;;  %v4106_v34 = vld [vmem:[%s5434_s4 + $0x30] sm:$0xff]  }
 0x129   :  { %v585_v51 = vmax.f32 %v469_v44, 0.0  ;;  %v718_v55 = vsel %vm4546_vm9, %v3504_v47, %v717_v48  ;;  %v719_v61 = vrot.slane %v717_v48, 4  ;;  %v4098_v44 = vld [vmem:[%s5434_s4 + $0x10] sm:$0xff]  }
 0x12b   :  { %v616_v53 = vpack.c.bf16 %v585_v51, %v584_v50  ;;  %3779 = vmatpush3.bf16.msra.mxu1 %v4098_v44 }
 0x12c   :  { %v473_v54 = vpop.f32.mrb[20].mxu0  ;;  %v4552_v56 = vld [vmem:[#allocation2 + $0x18] ss:$0 sps:$4 sm:$0x77]   ;;  %723 = vrot.lane.b32.xlu0 %v718_v55, %s4266_s3  ;;  %v737_v59 = vld [vmem:[#allocation2 + $0x18] sm:$0xf8] }
 0x12d   :  { %635 = vst.msk [vmem:[#allocation2 + $0x20] sm:$0xff] %vm630_vm1, %v616_v53  ;;  %v474_v57 = vadd.f32 %v4516_v49, %v473_v54  ;;  %v475_v58 = vpop.f32.mrb[21].mxu0  ;;  %v720_v62 = vrot.slane %v4552_v56, 6  ;;  %v3505_v63 = vcombine.low %v737_v59, %v737_v59  ;;  %v3506_v0 = vcombine.high %v737_v59, %v737_v59  ;;  %v4099_v55 = vld [vmem:[%s5434_s4 + $0x58] sm:$0xff]  }
 0x12e   :  { %v476_v60 = vpop.f32.mrb[22].mxu0  ;;  %3780 = vmatprep.subr.bf16.mxu1 %v4099_v55 }
 0x12f   :  { %v477_v2 = vadd.f32 %v4516_v49, %v476_v60  ;;  %v478_v3 = vpop.f32.mrb[23].mxu0  ;;  %v721_v5 = vsel %vm4546_vm9, %v719_v61, %v720_v62  ;;  %v3508_v6 = vrot.slane %v3505_v63, 11  ;;  %v752_v7 = vrot.slane %v3506_v0, 7 }
 0x130   :  { %v586_v10 = vmax.f32 %v474_v57, 0.0  ;;  %725 = vrot.lane.b32.xlu1 %v721_v5, %s4266_s3  ;;  %692 = vrot.lane.b32.xlu0 %v687_v4, %s4265_s0  ;;  %v4100_v57 = vld [vmem:[%s5434_s4 + $0x18] sm:$0xff]   ;;  %v4101_v5 = vld [vmem:[%s5434_s4 + $0x60] sm:$0xff]  }
 0x131   :  { %v587_v11 = vmax.f32 %v477_v2, 0.0  ;;  %v753_v15 = vsel %vm4573_vm12, %v3508_v6, %v752_v7  ;;  %v754_v21 = vrot.slane %v752_v7, 4  ;;  %3781 = vmatpush3.bf16.msra.mxu1 %v4100_v57  ;;  %v4102_v6 = vld [vmem:[%s5434_s4 + $0x20] sm:$0xff]  }
 0x132   :  { %3782 = vmatprep.subr.bf16.mxu1 %v4101_v5 }
 0x133   :  { %v617_v13 = vpack.c.bf16 %v587_v11, %v586_v10 }
 0x134   :  { %v481_v14 = vpop.f32.mrb[24].mxu0  ;;  %v4579_v16 = vld [vmem:[#allocation2 + $0x20] ss:$0 sps:$4 sm:$0xff]   ;;  %758 = vrot.lane.b32.xlu0 %v753_v15, %s4267_s29  ;;  %v4093_v19 = vld [vmem:[#allocation2 + $0x24] ss:$0 sps:$4 sm:$0xff]  }
 0x135   :  { %636 = vst.msk [vmem:[#allocation2 + $0x28] sm:$0xff] %vm630_vm1, %v617_v13  ;;  %v482_v17 = vadd.f32 %v4516_v49, %v481_v14  ;;  %v483_v18 = vpop.f32.mrb[25].mxu0  ;;  %v755_v22 = vrot.slane %v4579_v16, 7  ;;  %3783 = vmatpush3.bf16.msra.mxu1 %v4102_v6 }
 0x136   :  { %v484_v20 = vpop.f32.mrb[26].mxu0  ;;  %785 = vst.msk [vmem:[#allocation3 + $0x4] sm:$0xf] %vm662_vm2, %v4093_v19  ;;  %v4103_v18 = vld [vmem:[%s5434_s4 + $0x68] sm:$0xff]  }
 0x137   :  { %v485_v23 = vadd.f32 %v4516_v49, %v484_v20  ;;  %v486_v24 = vpop.f32.mrb[27].mxu0  ;;  %v756_v26 = vsel %vm4573_vm12, %v754_v21, %v755_v22  ;;  %v588_v27 = vmax.f32 %v482_v17, 0.0  ;;  %v4104_v20 = vld [vmem:[%s5434_s4 + $0x28] sm:$0xff]   ;;  %3784 = vmatprep.subr.bf16.mxu1 %v4103_v18  ;;  %v757_v56 = vrot.slane %v755_v22, 4 }
 0x138   :  { %760 = vrot.lane.b32.xlu1 %v756_v26, %s4267_s29 }
 0x139   :  { %v589_v28 = vmax.f32 %v485_v23, 0.0  ;;  %3785 = vmatpush3.bf16.msra.mxu1 %v4104_v20 }
 0x13a   :  { %3786 = vmatprep.subr.bf16.mxu1 %v4105_v33 }
 0x13b   :  { %v618_v29 = vpack.c.bf16 %v589_v28, %v588_v27 }
 0x13c   :  { %v489_v30 = vpop.f32.mrb[28].mxu0  ;;  %v773_v35 = vld [vmem:[#allocation2 + $0x28] sm:$0x1f] }
 0x13d   :  { %637 = vst.msk [vmem:[#allocation2 + $0x30] sm:$0xff] %vm630_vm1, %v618_v29  ;;  %v490_v31 = vadd.f32 %v4516_v49, %v489_v30  ;;  %v491_v32 = vpop.f32.mrb[29].mxu0  ;;  %v3511_v37 = vcombine.high %v773_v35, %v773_v35  ;;  %v3510_v38 = vcombine.low %v773_v35, %v773_v35  ;;  %v4064_v46 = vld [vmem:[#allocation2 + $0x2c] ss:$0 sps:$4 sm:$0xee]   ;;  %3787 = vmatpush3.bf16.msra.mxu1 %v4106_v34 }
 0x13e   :  { %v492_v36 = vpop.f32.mrb[30].mxu0  ;;  %v3515_v61 = vrot.slane %v4064_v46, 9 }
 0x13f   :  { %v493_v39 = vadd.f32 %v4516_v49, %v492_v36  ;;  %v494_v40 = vpop.f32.mrb[31].mxu0  ;;  %787 = vst.msk [vmem:[#allocation3 + $0x24] sm:$0x1] %vm665_vm5, %v3511_v37  ;;  %v590_v41 = vmax.f32 %v490_v31, 0.0 }
 0x140   :  { %786 = vst.msk [vmem:[#allocation3 + $0x14] sm:$0xf] %vm662_vm2, %v3510_v38 }
 0x141   :  { %v591_v42 = vmax.f32 %v493_v39, 0.0 }
 0x143   :  { %v619_v45 = vpack.c.bf16 %v591_v42, %v590_v41 }
 0x144   :  { %v497_v47 = vpop.f32.mrb[32].mxu0  ;;  %v789_v48 = vld [vmem:[#allocation2 + $0x30] sm:$0x3f] }
 0x145   :  { %638 = vst.msk [vmem:[#allocation2 + $0x38] sm:$0xff] %vm630_vm1, %v619_v45  ;;  %v498_v50 = vadd.f32 %v4516_v49, %v497_v47  ;;  %v499_v51 = vpop.f32.mrb[33].mxu0  ;;  %v3513_v53 = vcombine.low %v789_v48, %v789_v48  ;;  %v3514_v54 = vcombine.high %v789_v48, %v789_v48  ;;  %v4066_v9 = vld [vmem:[#allocation2 + $0x34] ss:$0 sps:$4 sm:$0xcc]   ;;  %v4107_v45 = vld [vmem:[%s5434_s4 + $0x78] sm:$0xff]  }
 0x146   :  { %v500_v58 = vpop.f32.mrb[34].mxu0  ;;  %v3519_v24 = vrot.slane %v4066_v9, 10  ;;  %v4108_v47 = vld [vmem:[%s5434_s4 + $0x38] sm:$0xff]   ;;  %3788 = vmatprep.subr.bf16.mxu1 %v4107_v45 }
 0x147   :  { %v501_v59 = vadd.f32 %v4516_v49, %v500_v58  ;;  %v502_v60 = vpop.f32.mrb[35].mxu0  ;;  %v800_v63 = vrot.slane %v3513_v53, 5  ;;  %v803_v0 = vrot.slane %v3514_v54, 5  ;;  %v592_v2 = vmax.f32 %v498_v50, 0.0  ;;  %3789 = vmatpush3.bf16.msra.mxu1 %v4108_v47 }
 0x149   :  { %v593_v3 = vmax.f32 %v501_v59, 0.0  ;;  %v801_v4 = vsel %vm4530_vm6, %v3515_v61, %v800_v63  ;;  %v805_v8 = vrot.slane %v803_v0, 4  ;;  %v802_v11 = vrot.slane %v800_v63, 4 }
 0x14a   :  { %806 = vrot.lane.b32.xlu1 %v801_v4, %s4265_s0 }
 0x14b   :  { %v620_v7 = vpack.c.bf16 %v593_v3, %v592_v2  ;;  %v804_v28 = vsel %vm4530_vm6, %v802_v11, %v803_v0  ;;  %v722_v0 = vrot.slane %v720_v62, 4 }
 0x14c   :  { %v505_v10 = vpop.f32.mrb[36].mxu0  ;;  %v819_v13 = vld [vmem:[#allocation2 + $0x38] sm:$0x7f] }
 0x14d   :  { %639 = vst.msk [vmem:[#allocation2 + $0x40] sm:$0xff] %vm630_vm1, %v620_v7  ;;  %v506_v14 = vadd.f32 %v4516_v49, %v505_v10  ;;  %v507_v15 = vpop.f32.mrb[37].mxu0  ;;  %v3517_v17 = vcombine.low %v819_v13, %v819_v13  ;;  %v3518_v27 = vcombine.high %v819_v13, %v819_v13  ;;  %v4068_v37 = vld [vmem:[#allocation2 + $0x3c] ss:$0 sps:$4 sm:$0x88]  }
 0x14e   :  { %v508_v19 = vpop.f32.mrb[38].mxu0  ;;  %810 = vrot.lane.b32.xlu1 %v805_v8, %s4265_s0  ;;  %v3523_v51 = vrot.slane %v4068_v37, 11 }
 0x14f   :  { %v509_v21 = vadd.f32 %v4516_v49, %v508_v19  ;;  %v510_v23 = vpop.f32.mrb[39].mxu0  ;;  %v830_v26 = vrot.slane %v3517_v17, 6  ;;  %v594_v29 = vmax.f32 %v506_v14, 0.0  ;;  %v833_v36 = vrot.slane %v3518_v27, 6 }
 0x151   :  { %v595_v30 = vmax.f32 %v509_v21, 0.0  ;;  %v831_v31 = vsel %vm4546_vm9, %v3519_v24, %v830_v26  ;;  %v832_v32 = vrot.slane %v830_v26, 4  ;;  %v835_v8 = vrot.slane %v833_v36, 4 }
 0x152   :  { %808 = vrot.lane.b32.xlu1 %v804_v28, %s4265_s0  ;;  %836 = vrot.lane.b32.xlu0 %v831_v31, %s4266_s3 }
 0x153   :  { %v621_v35 = vpack.c.bf16 %v595_v30, %v594_v29  ;;  %v834_v42 = vsel %vm4546_vm9, %v832_v32, %v833_v36 }
 0x154   :  { %v513_v38 = vpop.f32.mrb[40].mxu0  ;;  %v849_v39 = vld [vmem:[#allocation2 + $0x40] sm:$0xff] }
 0x155   :  { %640 = vst.msk [vmem:[#allocation2 + $0x48] sm:$0xff] %vm630_vm1, %v621_v35  ;;  %v514_v40 = vadd.f32 %v4516_v49, %v513_v38  ;;  %v515_v41 = vpop.f32.mrb[41].mxu0  ;;  %v3521_v43 = vcombine.low %v849_v39, %v849_v39  ;;  %v3522_v44 = vcombine.high %v849_v39, %v849_v39 }
 0x156   :  { %v516_v46 = vpop.f32.mrb[42].mxu0  ;;  %838 = vrot.lane.b32.xlu1 %v834_v42, %s4266_s3 }
 0x157   :  { %v517_v48 = vadd.f32 %v4516_v49, %v516_v46  ;;  %v518_v50 = vpop.f32.mrb[43].mxu0  ;;  %v860_v53 = vrot.slane %v3521_v43, 7  ;;  %v596_v54 = vmax.f32 %v514_v40, 0.0  ;;  %v863_v59 = vrot.slane %v3522_v44, 7 }
 0x159   :  { %v597_v55 = vmax.f32 %v517_v48, 0.0  ;;  %v861_v57 = vsel %vm4573_vm12, %v3523_v51, %v860_v53  ;;  %v862_v58 = vrot.slane %v860_v53, 4  ;;  %v865_v13 = vrot.slane %v863_v59, 4 }
 0x15a   :  { %866 = vrot.lane.b32.xlu0 %v861_v57, %s4267_s29 }
 0x15b   :  { %v622_v60 = vpack.c.bf16 %v597_v55, %v596_v54  ;;  %v864_v61 = vsel %vm4573_vm12, %v862_v58, %v863_v59  ;;  %v4115_v59 = vld [vmem:[%s5434_s4 + $0xc0] sm:$0xff]  }
 0x15c   :  { %v521_v63 = vpop.f32.mrb[44].mxu0  ;;  %868 = vrot.lane.b32.xlu1 %v864_v61, %s4267_s29  ;;  %v878_v2 = vld [vmem:[#allocation2 + $0x48] sm:$0xff]  ;;  %3802 = vmatprep.subr.bf16.mxu1 %v4115_v59 }
 0x15d   :  { %641 = vst.msk [vmem:[#allocation2 + $0x50] sm:$0xff] %vm630_vm1, %v622_v60  ;;  %v522_v3 = vadd.f32 %v4516_v49, %v521_v63  ;;  %v523_v4 = vpop.f32.mrb[45].mxu0  ;;  %v3524_v5 = vcombine.low %v878_v2, %v878_v2  ;;  %v3525_v6 = vcombine.high %v878_v2, %v878_v2 }
 0x15e   :  { %v524_v7 = vpop.f32.mrb[46].mxu0  ;;  %727 = vrot.lane.b32.xlu0 %v722_v0, %s4266_s3 }
 0x15f   :  { %v525_v9 = vadd.f32 %v4516_v49, %v524_v7  ;;  %v526_v10 = vpop.f32.mrb[47].mxu0  ;;  %891 = vst.msk [vmem:[#allocation3 + $0x8] sm:$0xf] %vm662_vm2, %v3524_v5  ;;  %892 = vst.msk [vmem:[#allocation3 + $0x18] sm:$0xf] %vm662_vm2, %v3525_v6  ;;  %v598_v62 = vmax.f32 %v522_v3, 0.0 }
 0x160   :  { %840 = vrot.lane.b32.xlu1 %v835_v8, %s4266_s3 }
 0x161   :  { %v599_v11 = vmax.f32 %v525_v9, 0.0 }
 0x162   :  { %762 = vrot.lane.b32.xlu0 %v757_v56, %s4267_s29 }
 0x163   :  { %v623_v14 = vpack.c.bf16 %v599_v11, %v598_v62 }
 0x164   :  { %v529_v15 = vpop.f32.mrb[48].mxu0  ;;  %870 = vrot.lane.b32.xlu1 %v865_v13, %s4267_s29  ;;  %v894_v17 = vld [vmem:[#allocation2 + $0x50] sm:$0xfe]  ;;  %v4129_v23 = vld [vmem:[#allocation2 + $0x50] ss:$0 sps:$4 sm:$0x11]  }
 0x165   :  { %642 = vst.msk [vmem:[#allocation2 + $0x58] sm:$0xff] %vm630_vm1, %v623_v14  ;;  %v530_v18 = vadd.f32 %v4516_v49, %v529_v15  ;;  %v531_v19 = vpop.f32.mrb[49].mxu0  ;;  %v3527_v20 = vcombine.low %v894_v17, %v894_v17  ;;  %v3528_v21 = vcombine.high %v894_v17, %v894_v17 }
 0x166   :  { %v532_v16 = vpop.f32.mrb[50].mxu0  ;;  %893 = vst.msk [vmem:[#allocation3 + $0x28] sm:$0x1] %vm665_vm5, %v4129_v23 }
 0x167   :  { %v533_v22 = vadd.f32 %v4516_v49, %v532_v16  ;;  %v534_v24 = vpop.f32.mrb[51].mxu0  ;;  %v3530_v26 = vrot.slane %v3527_v20, 9  ;;  %v906_v27 = vrot.slane %v3528_v21, 5  ;;  %v600_v28 = vmax.f32 %v530_v18, 0.0 }
 0x169   :  { %v601_v29 = vmax.f32 %v533_v22, 0.0  ;;  %v907_v30 = vsel %vm4530_vm6, %v3530_v26, %v906_v27  ;;  %v908_v38 = vrot.slane %v906_v27, 4 }
 0x16a   :  { %912 = vrot.lane.b32.xlu0 %v907_v30, %s4265_s0 }
 0x16b   :  { %v624_v31 = vpack.c.bf16 %v601_v29, %v600_v28 }
 0x16c   :  { %v537_v32 = vpop.f32.mrb[52].mxu0  ;;  %v4687_v33 = vld [vmem:[#allocation2 + $0x58] ss:$0 sps:$4 sm:$0x33]   ;;  %v924_v36 = vld [vmem:[#allocation2 + $0x58] sm:$0xfc] }
 0x16d   :  { %643 = vst.msk [vmem:[#allocation2 + $0x60] sm:$0xff] %vm630_vm1, %v624_v31  ;;  %v538_v34 = vadd.f32 %v4516_v49, %v537_v32  ;;  %v539_v35 = vpop.f32.mrb[53].mxu0  ;;  %v909_v39 = vrot.slane %v4687_v33, 5  ;;  %v3531_v40 = vcombine.low %v924_v36, %v924_v36  ;;  %v3532_v41 = vcombine.high %v924_v36, %v924_v36 }
 0x16e   :  { %v540_v37 = vpop.f32.mrb[54].mxu0 }
 0x16f   :  { %v541_v42 = vadd.f32 %v4516_v49, %v540_v37  ;;  %v542_v43 = vpop.f32.mrb[55].mxu0  ;;  %v910_v44 = vsel %vm4530_vm6, %v908_v38, %v909_v39  ;;  %v3534_v45 = vrot.slane %v3531_v40, 10  ;;  %v936_v46 = vrot.slane %v3532_v41, 6 }
 0x170   :  { %v602_v47 = vmax.f32 %v538_v34, 0.0  ;;  %914 = vrot.lane.b32.xlu1 %v910_v44, %s4265_s0 }
 0x171   :  { %v603_v48 = vmax.f32 %v541_v42, 0.0  ;;  %v937_v50 = vsel %vm4546_vm9, %v3534_v45, %v936_v46  ;;  %v938_v61 = vrot.slane %v936_v46, 4 }
 0x172   :  { %942 = vrot.lane.b32.xlu0 %v937_v50, %s4266_s3 }
 0x173   :  { %v625_v51 = vpack.c.bf16 %v603_v48, %v602_v47 }
 0x174   :  { %v545_v53 = vpop.f32.mrb[56].mxu0  ;;  %v4701_v54 = vld [vmem:[#allocation2 + $0x60] ss:$0 sps:$4 sm:$0x77]   ;;  %v954_v58 = vld [vmem:[#allocation2 + $0x60] sm:$0xf8] }
 0x175   :  { %644 = vst.msk [vmem:[#allocation2 + $0x68] sm:$0xff] %vm630_vm1, %v625_v51  ;;  %v546_v55 = vadd.f32 %v4516_v49, %v545_v53  ;;  %v547_v57 = vpop.f32.mrb[57].mxu0  ;;  %v939_v63 = vrot.slane %v4701_v54, 6  ;;  %v3535_v0 = vcombine.low %v954_v58, %v954_v58  ;;  %v3536_v2 = vcombine.high %v954_v58, %v954_v58 }
 0x176   :  { %v548_v60 = vpop.f32.mrb[58].mxu0 }
 0x177   :  { %v549_v3 = vadd.f32 %v4516_v49, %v548_v60  ;;  %v550_v4 = vpop.f32.mrb[59].mxu0  ;;  %v940_v5 = vsel %vm4546_vm9, %v938_v61, %v939_v63  ;;  %v3538_v6 = vrot.slane %v3535_v0, 11  ;;  %v966_v7 = vrot.slane %v3536_v2, 7 }
 0x178   :  { %v604_v8 = vmax.f32 %v546_v55, 0.0  ;;  %944 = vrot.lane.b32.xlu1 %v940_v5, %s4266_s3  ;;  %v941_v12 = vrot.slane %v939_v63, 4 }
 0x179   :  { %v605_v9 = vmax.f32 %v549_v3, 0.0  ;;  %v967_v10 = vsel %vm4573_vm12, %v3538_v6, %v966_v7  ;;  %v968_v18 = vrot.slane %v966_v7, 4 }
 0x17a   :  { %972 = vrot.lane.b32.xlu0 %v967_v10, %s4267_s29 }
 0x17b   :  { %v626_v56 = vpack.c.bf16 %v605_v9, %v604_v8 }
 0x17c   :  { %v553_v62 = vpop.f32.mrb[60].mxu0  ;;  %v4718_v11 = vld [vmem:[#allocation2 + $0x68] ss:$0 sps:$4 sm:$0xff]   ;;  %v4117_v15 = vld [vmem:[#allocation2 + $0x6c] ss:$0 sps:$4 sm:$0xff]  }
 0x17d   :  { %645 = vst.msk [vmem:[#allocation2 + $0x70] sm:$0xff] %vm630_vm1, %v626_v56  ;;  %v554_v13 = vadd.f32 %v4516_v49, %v553_v62  ;;  %v555_v14 = vpop.f32.mrb[61].mxu0  ;;  %v969_v19 = vrot.slane %v4718_v11, 7 }
 0x17e   :  { %v556_v17 = vpop.f32.mrb[62].mxu0  ;;  %997 = vst.msk [vmem:[#allocation3 + $0xc] sm:$0xf] %vm662_vm2, %v4117_v15 }
 0x17f   :  { %v557_v20 = vadd.f32 %v4516_v49, %v556_v17  ;;  %v558_v21 = vpop.f32.mrb[63].mxu0  ;;  %v970_v23 = vsel %vm4573_vm12, %v968_v18, %v969_v19  ;;  %v606_v16 = vmax.f32 %v554_v13, 0.0  ;;  %v971_v33 = vrot.slane %v969_v19, 4 }
 0x180   :  { %974 = vrot.lane.b32.xlu1 %v970_v23, %s4267_s29 }
 0x181   :  { %v607_v22 = vmax.f32 %v557_v20, 0.0 }
 0x183   :  { %v627_v24 = vpack.c.bf16 %v607_v22, %v606_v16 }
 0x184   :  { %v561_v26 = vpop.f32.mrb[64].mxu0  ;;  %v985_v29 = vld [vmem:[#allocation2 + $0x70] sm:$0x1f] }
 0x185   :  { %646 = vst.msk [vmem:[#allocation2 + $0x78] sm:$0xff] %vm630_vm1, %v627_v24  ;;  %v562_v27 = vadd.f32 %v4516_v49, %v561_v26  ;;  %v563_v28 = vpop.f32.mrb[65].mxu0  ;;  %v3540_v31 = vcombine.low %v985_v29, %v985_v29  ;;  %v3541_v32 = vcombine.high %v985_v29, %v985_v29  ;;  %v4080_v40 = vld [vmem:[#allocation2 + $0x74] ss:$0 sps:$4 sm:$0xee]   ;;  %v911_v26 = vrot.slane %v909_v39, 4 }
 0x186   :  { %v564_v30 = vpop.f32.mrb[66].mxu0  ;;  %v3545_v51 = vrot.slane %v4080_v40, 9 }
 0x187   :  { %v565_v34 = vadd.f32 %v4516_v49, %v564_v30  ;;  %v566_v35 = vpop.f32.mrb[67].mxu0  ;;  %998 = vst.msk [vmem:[#allocation3 + $0x1c] sm:$0xf] %vm662_vm2, %v3540_v31  ;;  %v608_v36 = vmax.f32 %v562_v27, 0.0  ;;  %vm735_vm2 = vcmask 778752  }
 0x188   :  { %999 = vst.msk [vmem:[#allocation3 + $0x2c] sm:$0x1] %vm665_vm5, %v3541_v32  ;;  %vm1508_vm5 = vcmask 516096  }
 0x189   :  { %v609_v37 = vmax.f32 %v565_v34, 0.0 }
 0x18b   :  { %v628_v38 = vpack.c.bf16 %v609_v37, %v608_v36 }
 0x18c   :  { %v569_v41 = vpop.f32.mrb[68].mxu0  ;;  %v1001_v42 = vld [vmem:[#allocation2 + $0x78] sm:$0x3f] }
 0x18d   :  { %647 = vst.msk [vmem:[#allocation2 + $0x80] sm:$0xff] %vm630_vm1, %v628_v38  ;;  %v570_v43 = vadd.f32 %v4516_v49, %v569_v41  ;;  %v571_v44 = vpop.f32.mrb[69].mxu0  ;;  %v3543_v45 = vcombine.low %v1001_v42, %v1001_v42  ;;  %v3544_v46 = vcombine.high %v1001_v42, %v1001_v42  ;;  %v4084_v2 = vld [vmem:[#allocation2 + $0x7c] ss:$0 sps:$4 sm:$0xcc]   ;;  %v4116_v38 = vld [vmem:[%s5434_s4 + $0x80] sm:$0xff]  }
 0x18e   :  { %v572_v47 = vpop.f32.mrb[70].mxu0  ;;  %v3549_v6 = vrot.slane %v4084_v2, 10  ;;  %v4120_v44 = vld [vmem:[%s5434_s4 + $0x88] sm:$0xff]  }
 0x18f   :  { %v573_v48 = vadd.f32 %v4516_v49, %v572_v47  ;;  %v574_v50 = vpop.f32.mrb[71].mxu0  ;;  %v1012_v53 = vrot.slane %v3543_v45, 5  ;;  %v610_v55 = vmax.f32 %v570_v43, 0.0  ;;  %v1015_v60 = vrot.slane %v3544_v46, 5  ;;  %v4119_v43 = vld [vmem:[%s5434_s4 + $0xc8] sm:$0xff]   ;;  %v4121_v45 = vld [vmem:[%s5434_s4 + $0xd0] sm:$0xff]  }
 0x190   :  { %v4128_v2 = vld [vmem:[%s5434_s4 + $0xa8] sm:$0xff]  }
 0x191   :  { %v611_v57 = vmax.f32 %v573_v48, 0.0  ;;  %v1013_v58 = vsel %vm4530_vm6, %v3545_v51, %v1012_v53  ;;  %v1014_v59 = vrot.slane %v1012_v53, 4  ;;  %v1017_v27 = vrot.slane %v1015_v60, 4  ;;  %v4122_v51 = vld [vmem:[%s5434_s4 + $0x90] sm:$0xff]   ;;  %v4123_v53 = vld [vmem:[%s5434_s4 + $0xd8] sm:$0xff]  }
 0x192   :  { %1018 = vrot.lane.b32.xlu0 %v1013_v58, %s4265_s0  ;;  %v4125_v58 = vld [vmem:[%s5434_s4 + $0xe0] sm:$0xff]  }
 0x193   :  { %v629_v61 = vpack.c.bf16 %v611_v57, %v610_v55  ;;  %v1016_v0 = vsel %vm4530_vm6, %v1014_v59, %v1015_v60  ;;  %v4124_v57 = vld [vmem:[%s5434_s4 + $0x98] sm:$0xff]   ;;  %v4126_v60 = vld [vmem:[%s5434_s4 + $0xa0] sm:$0xff]   ;;  %vm1532_vm6 = vcmask 1040896  }
 0x194   :  { %1020 = vrot.lane.b32.xlu1 %v1016_v0, %s4265_s0  ;;  %v689_v49 = vpop.permute.xlu0 %688  ;;  %v1031_v3 = vld [vmem:[#allocation2 + $0x80] sm:$0x7f] }
 0x195   :  { %648 = vst.msk [vmem:[#allocation2 + $0x88] sm:$0xff] %vm630_vm1, %v629_v61  ;;  %v3547_v4 = vcombine.low %v1031_v3, %v1031_v3  ;;  %v3548_v5 = vcombine.high %v1031_v3, %v1031_v3  ;;  %v4087_v62 = vld [vmem:[#allocation2 + $0x84] ss:$0 sps:$4 sm:$0x88]   ;;  %vm767_vm1 = vcmask 1044224   ;;  %v4127_v61 = vld [vmem:[%s5434_s4 + $0xe8] sm:$0xff]  }
 0x196   :  { %698 = vst.msk [vmem:[#allocation3] sm:$0xf] %vm697_vm13, %v689_v49  ;;  %v3553_v18 = vrot.slane %v4087_v62, 11  ;;  %v4130_v49 = vld [vmem:[%s5434_s4 + $0xf0] sm:$0xff]  }
 0x197   :  { %v1042_v7 = vrot.slane %v3547_v4, 6  ;;  %v1045_v10 = vrot.slane %v3548_v5, 6  ;;  %v4131_v4 = vld [vmem:[%s5434_s4 + $0xb0] sm:$0xff]   ;;  %v4132_v5 = vld [vmem:[%s5434_s4 + $0xf8] sm:$0xff]  }
 0x199   :  { %v1043_v8 = vsel %vm4546_vm9, %v3549_v6, %v1042_v7  ;;  %v1044_v9 = vrot.slane %v1042_v7, 4  ;;  %v1047_v29 = vrot.slane %v1045_v10, 4  ;;  %v4133_v7 = vld [vmem:[%s5434_s4 + $0xb8] sm:$0xff]  }
 0x19a   :  { %1048 = vrot.lane.b32.xlu0 %v1043_v8, %s4266_s3  ;;  %v691_v56 = vpop.permute.xlu0 %690 }
 0x19b   :  { %v1046_v25 = vsel %vm4546_vm9, %v1044_v9, %v1045_v10  ;;  %699 = vst.msk [vmem:[#allocation3 + $0x10] sm:$0xf] %vm697_vm13, %v691_v56 }
 0x19c   :  { %1050 = vrot.lane.b32.xlu1 %v1046_v25, %s4266_s3  ;;  %v1061_v13 = vld [vmem:[#allocation2 + $0x88] sm:$0xff] }
 0x19d   :  { %v3551_v14 = vcombine.low %v1061_v13, %v1061_v13  ;;  %v3552_v15 = vcombine.high %v1061_v13, %v1061_v13 }
 0x19e   :  { %v724_v17 = vpop.permute.xlu0 %723 }
 0x19f   :  { %v1072_v20 = vrot.slane %v3551_v14, 7  ;;  %733 = vst.msk [vmem:[#allocation3] sm:$0xf] %vm732_vm14, %v724_v17  ;;  %v1075_v23 = vrot.slane %v3552_v15, 7 }
 0x1a1   :  { %v1073_v21 = vsel %vm4573_vm12, %v3553_v18, %v1072_v20  ;;  %v1074_v52 = vrot.slane %v1072_v20, 4  ;;  %v1077_v39 = vrot.slane %v1075_v23, 4 }
 0x1a2   :  { %1078 = vrot.lane.b32.xlu0 %v1073_v21, %s4267_s29  ;;  %v726_v22 = vpop.permute.xlu1 %725  ;;  %v693_v24 = vpop.permute.xlu0 %692 }
 0x1a3   :  { %v1076_v16 = vsel %vm4573_vm12, %v1074_v52, %v1075_v23  ;;  %734 = vst.msk [vmem:[#allocation3 + $0x10] sm:$0xf] %vm732_vm14, %v726_v22 }
 0x1a4   :  { %1080 = vrot.lane.b32.xlu1 %v1076_v16, %s4267_s29  ;;  %701 = vst.msk [vmem:[#allocation3 + $0x20] sm:$0x1] %vm700_vm15, %v693_v24  ;;  %v4139_v24 = vld [vmem:[%s5436_s6 + $0x40] sm:$0xff]  }
 0x1a6   :  { %916 = vrot.lane.b32.xlu0 %v911_v26, %s4265_s0  ;;  %v759_v28 = vpop.permute.xlu0 %758  ;;  %v4140_v26 = vld [vmem:[%s5436_s6] sm:$0xff]  }
 0x1a7   :  { %768 = vst.msk [vmem:[#allocation3] sm:$0xf] %vm767_vm1, %v759_v28  ;;  %v4142_v28 = vld [vmem:[%s5436_s6 + $0x8] sm:$0xff]  }
 0x1a8   :  { %1022 = vrot.lane.b32.xlu1 %v1017_v27, %s4265_s0  ;;  %v4141_v27 = vld [vmem:[%s5436_s6 + $0x48] sm:$0xff]  }
 0x1aa   :  { %946 = vrot.lane.b32.xlu0 %v941_v12, %s4266_s3  ;;  %v761_v30 = vpop.permute.xlu1 %760  ;;  %v4143_v12 = vld [vmem:[%s5436_s6 + $0x50] sm:$0xff]  }
 0x1ab   :  { %769 = vst.msk [vmem:[#allocation3 + $0x10] sm:$0xf] %vm767_vm1, %v761_v30 }
 0x1ac   :  { %1052 = vrot.lane.b32.xlu1 %v1047_v29, %s4266_s3  ;;  %v4144_v29 = vld [vmem:[%s5436_s6 + $0x10] sm:$0xff]  }
 0x1ae   :  { %976 = vrot.lane.b32.xlu0 %v971_v33, %s4267_s29 }
 0x1b0   :  { %1082 = vrot.lane.b32.xlu1 %v1077_v39, %s4267_s29 }
 0x1b2   :  { %v4109_v41 = vld [vmem:[#allocation3] ss:$16 sps:$4 sm:$0xff]  }
 0x1bc   :  { %v807_v31 = vpop.permute.xlu1 %806 }
 0x1bd   :  { %815 = vst.msk [vmem:[#allocation3 + $0x4] sm:$0xf] %vm697_vm13, %v807_v31 }
 0x1c0   :  { %v811_v54 = vpop.permute.xlu1 %810 }
 0x1c1   :  { %817 = vst.msk [vmem:[#allocation3 + $0x24] sm:$0x1] %vm700_vm15, %v811_v54 }
 0x1c4   :  { %v809_v63 = vpop.permute.xlu1 %808  ;;  %v837_v32 = vpop.permute.xlu0 %836 }
 0x1c5   :  { %816 = vst.msk [vmem:[#allocation3 + $0x14] sm:$0xf] %vm697_vm13, %v809_v63 }
 0x1c6   :  { %845 = vst.msk [vmem:[#allocation3 + $0x4] sm:$0xf] %vm732_vm14, %v837_v32 }
 0x1c8   :  { %v839_v34 = vpop.permute.xlu1 %838 }
 0x1c9   :  { %846 = vst.msk [vmem:[#allocation3 + $0x14] sm:$0xf] %vm732_vm14, %v839_v34 }
 0x1cc   :  { %v867_v11 = vpop.permute.xlu0 %866 }
 0x1cd   :  { %875 = vst.msk [vmem:[#allocation3 + $0x4] sm:$0xf] %vm767_vm1, %v867_v11 }
 0x1ce   :  { %v869_v19 = vpop.permute.xlu1 %868 }
 0x1cf   :  { %876 = vst.msk [vmem:[#allocation3 + $0x14] sm:$0xf] %vm767_vm1, %v869_v19 }
 0x1d0   :  { %v728_v35 = vpop.permute.xlu0 %727 }
 0x1d1   :  { %736 = vst.msk [vmem:[#allocation3 + $0x20] sm:$0x1] %vm735_vm2, %v728_v35 }
 0x1d2   :  { %v841_v36 = vpop.permute.xlu1 %840 }
 0x1d3   :  { %847 = vst.msk [vmem:[#allocation3 + $0x24] sm:$0x1] %vm735_vm2, %v841_v36  ;;  %v3554_v36 = vld [vmem:[%s5435_s5] ss:$0 sm:$0xff] }
 0x1d4   :  { %v763_v37 = vpop.permute.xlu0 %762 }
 0x1d5   :  { %771 = vst.msk [vmem:[#allocation3 + $0x20] sm:$0x1] %vm770_vm3, %v763_v37 }
 0x1d6   :  { %v871_v40 = vpop.permute.xlu1 %870  ;;  %v4111_v42 = vld [vmem:[#allocation3 + $0x4] ss:$16 sps:$4 sm:$0xff]  }
 0x1d7   :  { %877 = vst.msk [vmem:[#allocation3 + $0x24] sm:$0x1] %vm770_vm3, %v871_v40  ;;  %1425 = vmatprep.mubr.bf16.mxu1 %v4111_v42 }
 0x1d8   :  { %1426 = vmatmul.mubr.bf16.vlgmr.msra.gmra.mrb[0].mxu1 %v4109_v41 }
 0x1d9   :  { %3803 = vmatpush3.bf16.msra.mxu1 %v4116_v38 }
 0x1da   :  { %3804 = vmatprep.subr.bf16.mxu1 %v4119_v43 }
 0x1dc   :  { %v913_v46 = vpop.permute.xlu0 %912 }
 0x1dd   :  { %921 = vst.msk [vmem:[#allocation3 + $0x8] sm:$0xf] %vm697_vm13, %v913_v46  ;;  %3805 = vmatpush3.bf16.msra.mxu1 %v4120_v44 }
 0x1de   :  { %v1094_v47 = vld [vmem:[#allocation3 + $0x20] sm:$0x11]  ;;  %3806 = vmatprep.subr.bf16.mxu1 %v4121_v45 }
 0x1df   :  { %v3560_v48 = vcombine.high %v1094_v47, %v1094_v47  ;;  %v3559_v50 = vcombine.low %v1094_v47, %v1094_v47 }
 0x1e1   :  { %1433 = vmatprep.mubr.bf16.mxu1 %v3560_v48  ;;  %3807 = vmatpush3.bf16.msra.mxu1 %v4122_v51 }
 0x1e2   :  { %1434 = vmatmul.mubr.bf16.gmra.mrb[4].mxu1 %v3559_v50  ;;  %v915_v55 = vpop.permute.xlu1 %914  ;;  %3808 = vmatprep.subr.bf16.mxu1 %v4123_v53  ;;  %v4145_v53 = vld [vmem:[%s5436_s6 + $0x58] sm:$0xff]  }
 0x1e3   :  { %922 = vst.msk [vmem:[#allocation3 + $0x18] sm:$0xf] %vm697_vm13, %v915_v55  ;;  %v4146_v55 = vld [vmem:[%s5436_s6 + $0x18] sm:$0xff]  }
 0x1e4   :  { %v943_v59 = vpop.permute.xlu0 %942 }
 0x1e5   :  { %951 = vst.msk [vmem:[#allocation3 + $0x8] sm:$0xf] %vm732_vm14, %v943_v59  ;;  %3809 = vmatpush3.bf16.msra.mxu1 %v4124_v57 }
 0x1e6   :  { %3810 = vmatprep.subr.bf16.mxu1 %v4125_v58  ;;  %v4268_v58 = vmov 1966171168  }
 0x1e7   :  { %v1523_v59 = vunpack.c.l.s4 %v4268_v58  ;;  %v2147_v58 = vld [vmem:[%s5438_s8 + $0x108] sm:$0xff] }
 0x1e9   :  { %3811 = vmatpush3.bf16.msra.mxu1 %v4126_v60  ;;  %v1525_v60 = vlaneseq }
 0x1ea   :  { %v945_v0 = vpop.permute.xlu1 %944  ;;  %3812 = vmatprep.subr.bf16.mxu1 %v4127_v61 }
 0x1eb   :  { %952 = vst.msk [vmem:[#allocation3 + $0x18] sm:$0xf] %vm732_vm14, %v945_v0  ;;  %v4147_v0 = vld [vmem:[%s5436_s6 + $0x60] sm:$0xff]  }
 0x1ec   :  { %v973_v3 = vpop.permute.xlu0 %972 }
 0x1ed   :  { %981 = vst.msk [vmem:[#allocation3 + $0x8] sm:$0xf] %vm767_vm1, %v973_v3  ;;  %3813 = vmatpush3.bf16.msra.mxu1 %v4128_v2  ;;  %v4148_v2 = vld [vmem:[%s5436_s6 + $0x20] sm:$0xff]   ;;  %v1524_v3 = vunpack.c.0.s8 %v1523_v59  ;;  %v2151_v59 = vld [vmem:[%s5438_s8 + $0x128] sm:$0xff] }
 0x1ee   :  { %3814 = vmatprep.subr.bf16.mxu1 %v4130_v49 }
 0x1f1   :  { %3815 = vmatpush3.bf16.msra.mxu1 %v4131_v4  ;;  %v4883_v4 = vshrl.u32 %v1525_v60, 7 }
 0x1f2   :  { %v975_v6 = vpop.permute.xlu1 %974  ;;  %3816 = vmatprep.subr.bf16.mxu1 %v4132_v5 }
 0x1f3   :  { %982 = vst.msk [vmem:[#allocation3 + $0x18] sm:$0xf] %vm767_vm1, %v975_v6 }
 0x1f5   :  { %3817 = vmatpush3.bf16.msra.mxu1 %v4133_v7 }
 0x1f6   :  { %3830 = vmatprep.subr.bf16.mxu1 %v4139_v24 }
 0x1fa   :  { %v4134_v18 = vld [vmem:[#allocation3 + $0x8] ss:$16 sps:$4 sm:$0xff]  }
 0x204   :  { %v1019_v8 = vpop.permute.xlu0 %1018 }
 0x205   :  { %1027 = vst.msk [vmem:[#allocation3 + $0xc] sm:$0xf] %vm697_vm13, %v1019_v8 }
 0x206   :  { %v1021_v9 = vpop.permute.xlu1 %1020 }
 0x207   :  { %1028 = vst.msk [vmem:[#allocation3 + $0x1c] sm:$0xf] %vm697_vm13, %v1021_v9  ;;  %v4149_v9 = vld [vmem:[%s5436_s6 + $0x68] sm:$0xff]  }
 0x20c   :  { %v1049_v10 = vpop.permute.xlu0 %1048 }
 0x20d   :  { %1057 = vst.msk [vmem:[#allocation3 + $0xc] sm:$0xf] %vm732_vm14, %v1049_v10  ;;  %v4150_v10 = vld [vmem:[%s5436_s6 + $0x28] sm:$0xff]  }
 0x20e   :  { %v1051_v25 = vpop.permute.xlu1 %1050 }
 0x20f   :  { %1058 = vst.msk [vmem:[#allocation3 + $0x1c] sm:$0xf] %vm732_vm14, %v1051_v25  ;;  %v4151_v25 = vld [vmem:[%s5436_s6 + $0x70] sm:$0xff]  }
 0x214   :  { %v1079_v56 = vpop.permute.xlu0 %1078 }
 0x215   :  { %1087 = vst.msk [vmem:[#allocation3 + $0xc] sm:$0xf] %vm767_vm1, %v1079_v56 }
 0x216   :  { %v1081_v62 = vpop.permute.xlu1 %1080 }
 0x217   :  { %1088 = vst.msk [vmem:[#allocation3 + $0x1c] sm:$0xf] %vm767_vm1, %v1081_v62 }
 0x218   :  { %v917_v13 = vpop.permute.xlu0 %916 }
 0x219   :  { %923 = vst.msk [vmem:[#allocation3 + $0x28] sm:$0x1] %vm700_vm15, %v917_v13 }
 0x21a   :  { %v1023_v14 = vpop.permute.xlu1 %1022 }
 0x21b   :  { %1029 = vst.msk [vmem:[#allocation3 + $0x2c] sm:$0x1] %vm700_vm15, %v1023_v14 }
 0x21c   :  { %v947_v15 = vpop.permute.xlu0 %946 }
 0x21d   :  { %953 = vst.msk [vmem:[#allocation3 + $0x28] sm:$0x1] %vm735_vm2, %v947_v15  ;;  %v4895_v15 = vsub.s32 %v1524_v3, %v4883_v4 }
 0x21e   :  { %v1053_v17 = vpop.permute.xlu1 %1052  ;;  %v4136_v20 = vld [vmem:[#allocation3 + $0xc] ss:$16 sps:$4 sm:$0xff]  }
 0x21f   :  { %1059 = vst.msk [vmem:[#allocation3 + $0x2c] sm:$0x1] %vm735_vm2, %v1053_v17  ;;  %1473 = vmatprep.mubr.bf16.mxu1 %v4136_v20 }
 0x220   :  { %v977_v21 = vpop.permute.xlu0 %976  ;;  %1474 = vmatmul.mubr.bf16.vlgmr.msra.gmra.mrb[8].mxu1 %v4134_v18 }
 0x221   :  { %983 = vst.msk [vmem:[#allocation3 + $0x28] sm:$0x1] %vm770_vm3, %v977_v21  ;;  %3831 = vmatpush3.bf16.msra.mxu1 %v4140_v26 }
 0x222   :  { %v1083_v52 = vpop.permute.xlu1 %1082  ;;  %3832 = vmatprep.subr.bf16.mxu1 %v4141_v27 }
 0x223   :  { %1089 = vst.msk [vmem:[#allocation3 + $0x2c] sm:$0x1] %vm770_vm3, %v1083_v52  ;;  %v4152_v52 = vld [vmem:[%s5436_s6 + $0x30] sm:$0xff]  }
 0x225   :  { %3833 = vmatpush3.bf16.msra.mxu1 %v4142_v28 }
 0x226   :  { %3834 = vmatprep.subr.bf16.mxu1 %v4143_v12 }
 0x229   :  { %3835 = vmatpush3.bf16.msra.mxu1 %v4144_v29  ;;  %v4153_v29 = vld [vmem:[%s5436_s6 + $0x78] sm:$0xff]  }
 0x22a   :  { %v1095_v23 = vld [vmem:[#allocation3 + $0x28] sm:$0x11]  ;;  %3836 = vmatprep.subr.bf16.mxu1 %v4145_v53  ;;  %v2143_v53 = vld [vmem:[%s5438_s8 + $0xe8] sm:$0xff] }
 0x22b   :  { %v3562_v16 = vcombine.high %v1095_v23, %v1095_v23  ;;  %v3561_v22 = vcombine.low %v1095_v23, %v1095_v23 }
 0x22d   :  { %1481 = vmatprep.mubr.bf16.mxu1 %v3562_v16  ;;  %3837 = vmatpush3.bf16.msra.mxu1 %v4146_v55 }
 0x22e   :  { %1482 = vmatmul.mubr.bf16.gmra.mrb[12].mxu1 %v3561_v22  ;;  %3838 = vmatprep.subr.bf16.mxu1 %v4147_v0  ;;  %v3676_v0 = vcombine.low %v2147_v58, %v2151_v59 }
 0x231   :  { %3839 = vmatpush3.bf16.msra.mxu1 %v4148_v2 }
 0x232   :  { %3840 = vmatprep.subr.bf16.mxu1 %v4149_v9 }
 0x235   :  { %3841 = vmatpush3.bf16.msra.mxu1 %v4150_v10  ;;  %v4157_v10 = vld [vmem:[%s5436_s6 + $0x80] sm:$0xff]  }
 0x236   :  { %3842 = vmatprep.subr.bf16.mxu1 %v4151_v25 }
 0x239   :  { %3843 = vmatpush3.bf16.msra.mxu1 %v4152_v52  ;;  %v4165_v52 = vld [vmem:[%s5436_s6 + $0xa0] sm:$0xff]  }
 0x23a   :  { %3844 = vmatprep.subr.bf16.mxu1 %v4153_v29  ;;  %v4269_v29 = vmov 0.0  }
 0x2ab   :  { %v3790_v30 = vpop.f32.mrb[0].mxu1 }
 0x2ac   :  { %v3791_v33 = vpop.f32.mrb[1].mxu1 }
 0x2ad   :  { %v3792_v39 = vadd.f32 %v3791_v33, %v3790_v30  ;;  %v3793_v31 = vpop.f32.mrb[2].mxu1 }
 0x2ae   :  { %v3794_v54 = vpop.f32.mrb[3].mxu1 }
 0x2af   :  { %v3795_v63 = vadd.f32 %v3794_v54, %v3793_v31  ;;  %v1428_v40 = vadd.f32 %v3792_v39, %v3554_v36 }
 0x2b1   :  { %v1431_v44 = vadd.f32 %v3795_v63, %v3554_v36 }
 0x2b5   :  { %v3796_v32 = vpop.f32.mrb[4].mxu1 }
 0x2b6   :  { %v3797_v34 = vpop.f32.mrb[5].mxu1 }
 0x2b7   :  { %v3798_v11 = vadd.f32 %v3797_v34, %v3796_v32  ;;  %v3799_v19 = vpop.f32.mrb[6].mxu1  ;;  %v4154_v34 = vld [vmem:[%s5436_s6 + $0x38] sm:$0xff]  }
 0x2b8   :  { %v3800_v35 = vpop.f32.mrb[7].mxu1  ;;  %3845 = vmatpush3.bf16.msra.mxu1 %v4154_v34  ;;  %v2159_v34 = vld [vmem:[%s5438_s8 + $0x168] sm:$0xff] }
 0x2b9   :  { %v1436_v5 = vadd.f32 %v3798_v11, %v3554_v36  ;;  %v4156_v36 = vld [vmem:[%s5436_s6 + $0xc0] sm:$0xff]  }
 0x2ba   :  { %3852 = vmatprep.subr.bf16.mxu1 %v4156_v36  ;;  %v2114_v36 = vld [vmem:[%s5438_s8] sm:$0xff] }
 0x2f3   :  { %v3818_v37 = vpop.f32.mrb[8].mxu1 }
 0x2f4   :  { %v3819_v38 = vpop.f32.mrb[9].mxu1 }
 0x2f5   :  { %v3820_v41 = vadd.f32 %v3819_v38, %v3818_v37  ;;  %v3821_v42 = vpop.f32.mrb[10].mxu1  ;;  %v2115_v37 = vld [vmem:[%s5438_s8 + $0x8] sm:$0xff] }
 0x2f6   :  { %v3822_v43 = vpop.f32.mrb[11].mxu1  ;;  %v2119_v38 = vld [vmem:[%s5438_s8 + $0x28] sm:$0xff] }
 0x2f7   :  { %v1476_v45 = vadd.f32 %v3820_v41, %v1428_v40  ;;  %v3823_v46 = vadd.f32 %v3822_v43, %v3821_v42  ;;  %v2123_v40 = vld [vmem:[%s5438_s8 + $0x48] sm:$0xff]  ;;  %v3644_v41 = vcombine.low %v2115_v37, %v2119_v38  ;;  %v3645_v42 = vcombine.high %v2115_v37, %v2119_v38  ;;  %v2118_v37 = vld [vmem:[%s5438_s8 + $0x20] sm:$0xff] }
 0x2f8   :  { %v2127_v43 = vld [vmem:[%s5438_s8 + $0x68] sm:$0xff] }
 0x2f9   :  { %v1489_v47 = vmax.f32 %v1476_v45, 0.0  ;;  %v1479_v48 = vadd.f32 %v3823_v46, %v1431_v44  ;;  %v2107_v44 = vld [vmem:[%s5431_s1] sm:$0x1]  ;;  %v3653_v45 = vcombine.high %v2123_v40, %v2127_v43  ;;  %v2131_v46 = vld [vmem:[%s5438_s8 + $0x88] sm:$0xff]  ;;  %2581 = vmatprep.subr.bf16.mxu0 %v3645_v42 }
 0x2fa   :  { %2582 = vmatpush1.bf16.msra.mxu0 %v3644_v41  ;;  %v3643_v41 = vcombine.high %v2114_v36, %v2118_v37 }
 0x2fb   :  { %v3771_v50 = vpack.c.bf16 %v1489_v47, %v1489_v47  ;;  %v1490_v51 = vmax.f32 %v1479_v48, 0.0  ;;  %v2135_v47 = vld [vmem:[%s5438_s8 + $0xa8] sm:$0xff]  ;;  %v3652_v48 = vcombine.low %v2123_v40, %v2127_v43  ;;  %2583 = vmatprep.subr.bf16.mxu0 %v3653_v45  ;;  %v3642_v40 = vcombine.low %v2114_v36, %v2118_v37  ;;  %v2122_v43 = vld [vmem:[%s5438_s8 + $0x40] sm:$0xff] }
 0x2fc   :  { %v3660_v55 = vcombine.low %v2131_v46, %v2135_v47 }
 0x2fd   :  { %1506 = vst.msk [vmem:[#allocation4] sm:$0xf] %vm1505_vm4, %v3771_v50  ;;  %v3772_v57 = vpack.c.bf16 %v1490_v51, %v1490_v51  ;;  %v3661_v50 = vcombine.high %v2131_v46, %v2135_v47  ;;  %v2139_v51 = vld [vmem:[%s5438_s8 + $0xc8] sm:$0xff]  ;;  %v2130_v47 = vld [vmem:[%s5438_s8 + $0x80] sm:$0xff] }
 0x2fe   :  { %2584 = vmatpush1.bf16.msra.mxu0 %v3652_v48  ;;  %v3668_v60 = vcombine.low %v2139_v51, %v2143_v53  ;;  %v2134_v48 = vld [vmem:[%s5438_s8 + $0xa0] sm:$0xff] }
 0x2ff   :  { %1507 = vst.msk [vmem:[#allocation4 + $0x4] sm:$0xf] %vm1505_vm4, %v3772_v57  ;;  %2585 = vmatprep.subr.bf16.mxu0 %v3661_v50  ;;  %v3669_v57 = vcombine.high %v2139_v51, %v2143_v53  ;;  %v3659_v50 = vcombine.high %v2130_v47, %v2134_v48  ;;  %v2138_v51 = vld [vmem:[%s5438_s8 + $0xc0] sm:$0xff] }
 0x300   :  { %v2142_v53 = vld [vmem:[%s5438_s8 + $0xe0] sm:$0xff] }
 0x301   :  { %v3824_v61 = vpop.f32.mrb[12].mxu1 }
 0x302   :  { %v3825_v49 = vpop.f32.mrb[13].mxu1  ;;  %2586 = vmatpush1.bf16.msra.mxu0 %v3660_v55  ;;  %v2171_v55 = vld [vmem:[%s5438_s8 + $0x1c8] sm:$0xff] }
 0x303   :  { %v3826_v6 = vadd.f32 %v3825_v49, %v3824_v61  ;;  %v3827_v7 = vpop.f32.mrb[14].mxu1  ;;  %2587 = vmatprep.subr.bf16.mxu0 %v3669_v57  ;;  %v3677_v61 = vcombine.high %v2147_v58, %v2151_v59  ;;  %v2175_v57 = vld [vmem:[%s5438_s8 + $0x1e8] sm:$0xff]  ;;  %v3658_v58 = vcombine.low %v2130_v47, %v2134_v48  ;;  %v2132_v48 = vld [vmem:[%s5438_s8 + $0x90] sm:$0xff] }
 0x304   :  { %v3828_v8 = vpop.f32.mrb[15].mxu1  ;;  %v3598_v62 = vld.sshfl [vmem:[#allocation4] sm:$0x10 pattern:$0x75316420]  ;;  %v3700_v59 = vcombine.low %v2171_v55, %v2175_v57 }
 0x305   :  { %v1484_v56 = vadd.f32 %v3826_v6, %v1436_v5  ;;  %v1510_v13 = vld [vmem:[#allocation4] sm:$0x1]  ;;  %v1521_v14 = vcombine.high %v3598_v62, %v3598_v62  ;;  %v3600_v17 = vld.sshfl [vmem:[#allocation4] sm:$0x20 pattern:$0x75316420] }
 0x306   :  { %1511 = vst.msk [vmem:[#allocation5] sm:$0x1] %vm1508_vm5, %v1510_v13  ;;  %v1562_v20 = vcombine.high %v3600_v17, %v3600_v17  ;;  %v3601_v21 = vld.sshfl [vmem:[#allocation4 + $0x4] sm:$0x10 pattern:$0x75316420]  ;;  %2588 = vmatpush1.bf16.msra.mxu0 %v3668_v60  ;;  %v3701_v60 = vcombine.high %v2171_v55, %v2175_v57 }
 0x307   :  { %v1491_v18 = vmax.f32 %v1484_v56, 0.0  ;;  %v1528_v23 = vrot.slane %v1521_v14, %v4895_v15  ;;  %v1586_v16 = vcombine.high %v3601_v21, %v3601_v21  ;;  %v3603_v22 = vld.sshfl [vmem:[#allocation4 + $0x4] sm:$0x20 pattern:$0x75316420]  ;;  %2589 = vmatprep.subr.bf16.mxu0 %v3677_v61  ;;  %v4158_v56 = vld [vmem:[%s5436_s6 + $0xc8] sm:$0xff]   ;;  %v3667_v61 = vcombine.high %v2138_v51, %v2142_v53 }
 0x308   :  { %v1575_v24 = vld [vmem:[#allocation4 + $0x4] sm:$0x1]  ;;  %v1569_v27 = vrot.slane %v1562_v20, %v4895_v15  ;;  %v1626_v28 = vcombine.high %v3603_v22, %v3603_v22  ;;  %v3599_v12 = vld.sshfl [vmem:[#allocation4] sm:$0x2 pattern:$0x75316420] }
 0x309   :  { %v3773_v26 = vpack.c.bf16 %v1491_v18, %v1491_v18  ;;  %1576 = vst.msk [vmem:[#allocation5 + $0x2] sm:$0x1] %vm1508_vm5, %v1575_v24  ;;  %1529 = vrot.lane.b32.xlu0 %v1528_v23, %s4266_s3  ;;  %v1549_v30 = vrot.slane %v3599_v12, %v4895_v15  ;;  %v3602_v33 = vld.sshfl [vmem:[#allocation4 + $0x4] sm:$0x2 pattern:$0x75316420]  ;;  %v1593_v63 = vrot.slane %v1586_v16, %v4895_v15 }
 0x30a   :  { %v1570_v39 = vcombine.high %v1569_v27, %v1569_v27  ;;  %v1633_v31 = vrot.slane %v1626_v28, %v4895_v15  ;;  %v1613_v54 = vrot.slane %v3602_v33, %v4895_v15  ;;  %2590 = vmatpush1.bf16.msra.mxu0 %v3676_v0  ;;  %v4159_v13 = vld [vmem:[%s5436_s6 + $0x88] sm:$0xff]   ;;  %v4160_v14 = vld [vmem:[%s5436_s6 + $0xd0] sm:$0xff]   ;;  %v4162_v18 = vld [vmem:[%s5436_s6 + $0xd8] sm:$0xff]  }
 0x30b   :  { %1509 = vst.msk [vmem:[#allocation4 + $0x8] sm:$0x1] %vm1508_vm5, %v3773_v26  ;;  %v1550_v32 = vcombine.high %v1549_v30, %v1549_v30  ;;  %v4161_v17 = vld [vmem:[%s5436_s6 + $0x90] sm:$0xff]   ;;  %v4163_v20 = vld [vmem:[%s5436_s6 + $0x98] sm:$0xff]   ;;  %v4164_v21 = vld [vmem:[%s5436_s6 + $0xe0] sm:$0xff]  }
 0x30c   :  { %1571 = vrot.lane.b32.xlu1 %v1570_v39, %s4266_s3  ;;  %v1614_v11 = vcombine.high %v1613_v54, %v1613_v54  ;;  %v1634_v19 = vcombine.high %v1633_v31, %v1633_v31  ;;  %v4166_v23 = vld [vmem:[%s5436_s6 + $0xe8] sm:$0xff]   ;;  %v4168_v22 = vld [vmem:[%s5436_s6 + $0xf0] sm:$0xff]   ;;  %v4170_v26 = vld [vmem:[%s5436_s6 + $0xf8] sm:$0xff]  }
 0x30d   :  { %1594 = vrot.lane.b32.xlu0 %v1593_v63, %s4266_s3  ;;  %1552 = vst.msk [vmem:[#allocation5 + $0x1] sm:$0x1] %vm1508_vm5, %v1550_v32  ;;  %v4167_v16 = vld [vmem:[%s5436_s6 + $0xa8] sm:$0xff]   ;;  %v4169_v24 = vld [vmem:[%s5436_s6 + $0xb0] sm:$0xff]   ;;  %v4171_v27 = vld [vmem:[%s5436_s6 + $0xb8] sm:$0xff]  }
 0x30e   :  { %1616 = vst.msk [vmem:[#allocation5 + $0x3] sm:$0x1] %vm1508_vm5, %v1614_v11  ;;  %v4172_v28 = vld [vmem:[%s5436_s6 + $0x100] sm:$0xff]   ;;  %v4173_v30 = vld [vmem:[%s5436_s6 + $0x108] sm:$0xff]   ;;  %v4174_v33 = vld [vmem:[%s5436_s6 + $0x110] sm:$0xff]  }
 0x30f   :  { %v4175_v31 = vld [vmem:[%s5436_s6 + $0x118] sm:$0xff]   ;;  %v2155_v32 = vld [vmem:[%s5438_s8 + $0x148] sm:$0xff]  ;;  %v2146_v0 = vld [vmem:[%s5438_s8 + $0x100] sm:$0xff] }
 0x310   :  { %1635 = vrot.lane.b32.xlu1 %v1634_v19, %s4266_s3  ;;  %v2163_v11 = vld [vmem:[%s5438_s8 + $0x188] sm:$0xff]  ;;  %v3684_v19 = vcombine.low %v2155_v32, %v2159_v34  ;;  %v2137_v55 = vld [vmem:[%s5438_s8 + $0xb8] sm:$0xff] }
 0x311   :  { %2109 = vrot.lane.b32.xlu0 %v2107_v44, %s4266_s3  ;;  %v2126_v44 = vld [vmem:[%s5438_s8 + $0x60] sm:$0xff] }
 0x312   :  { %v1639_v35 = vld [vmem:[#allocation4 + $0x8] sm:$0x1]  ;;  %v3650_v45 = vcombine.low %v2122_v43, %v2126_v44  ;;  %v3651_v46 = vcombine.high %v2122_v43, %v2126_v44  ;;  %v2128_v43 = vld [vmem:[%s5438_s8 + $0x70] sm:$0xff]  ;;  %v2125_v44 = vld [vmem:[%s5438_s8 + $0x58] sm:$0xff] }
 0x313   :  { %1640 = vst.msk [vmem:[#allocation5 + $0x4] sm:$0x1] %vm1508_vm5, %v1639_v35  ;;  %v3685_v35 = vcombine.high %v2155_v32, %v2159_v34 }
 0x315   :  { %2591 = vmatprep.subr.bf16.mxu0 %v3685_v35 }
 0x316   :  { %2592 = vmatpush1.bf16.msra.mxu0 %v3684_v19 }
 0x37b   :  { %v1530_v2 = vpop.permute.xlu0 %1529 }
 0x37c   :  { %1533 = vst.msk [vmem:[#allocation5] sm:$0x1] %vm1532_vm6, %v1530_v2  ;;  %v2150_v2 = vld [vmem:[%s5438_s8 + $0x120] sm:$0xff] }
 0x37e   :  { %v1572_v49 = vpop.permute.xlu1 %1571 }
 0x37f   :  { %1574 = vst.msk [vmem:[#allocation5 + $0x1] sm:$0x1] %vm1532_vm6, %v1572_v49  ;;  %v1595_v3 = vpop.permute.xlu0 %1594  ;;  %v3666_v49 = vcombine.low %v2138_v51, %v2142_v53  ;;  %v2133_v53 = vld [vmem:[%s5438_s8 + $0x98] sm:$0xff] }
 0x380   :  { %1597 = vst.msk [vmem:[#allocation5 + $0x2] sm:$0x1] %vm1532_vm6, %v1595_v3  ;;  %v3675_v3 = vcombine.high %v2146_v0, %v2150_v2 }
 0x382   :  { %v1636_v5 = vpop.permute.xlu1 %1635 }
 0x383   :  { %1638 = vst.msk [vmem:[#allocation5 + $0x3] sm:$0x1] %vm1532_vm6, %v1636_v5  ;;  %v3674_v5 = vcombine.low %v2146_v0, %v2150_v2  ;;  %v2144_v0 = vld [vmem:[%s5438_s8 + $0xf0] sm:$0xff]  ;;  %v2141_v2 = vld [vmem:[%s5438_s8 + $0xd8] sm:$0xff] }
 0x38a   :  { %v1641_v6 = vld [vmem:[#allocation5] sm:$0x1f] }
 0x38b   :  { %v1729_v7 = vrot.slane %v1641_v6, %v4895_v15  ;;  %v1722_v39 = vcombine.high %v1641_v6, %v1641_v6  ;;  %v2154_v6 = vld [vmem:[%s5438_s8 + $0x140] sm:$0xff] }
 0x38d   :  { %v1737_v8 = vcombine.high %v1729_v7, %v1729_v7  ;;  %v1744_v25 = vrot.slane %v1729_v7, %v4895_v15  ;;  %v1736_v54 = vrot.slane %v1722_v39, %v4895_v15  ;;  %v2158_v7 = vld [vmem:[%s5438_s8 + $0x160] sm:$0xff] }
 0x38f   :  { %v1758_v9 = vrot.slane %v1737_v8, %v4895_v15  ;;  %v1759_v12 = vcombine.high %v1744_v25, %v1744_v25  ;;  %v1751_v63 = vrot.slane %v1736_v54, %v4895_v15  ;;  %v2167_v15 = vld [vmem:[%s5438_s8 + $0x1a8] sm:$0xff]  ;;  %v3683_v8 = vcombine.high %v2154_v6, %v2158_v7 }
 0x390   :  { %v3693_v38 = vcombine.high %v2163_v11, %v2167_v15  ;;  %v3692_v42 = vcombine.low %v2163_v11, %v2167_v15 }
 0x391   :  { %2016 = vmatprep.mubr.bf16.mxu1 %v1758_v9  ;;  %v1760_v62 = vcombine.high %v1758_v9, %v1758_v9  ;;  %v3682_v9 = vcombine.low %v2154_v6, %v2158_v7 }
 0x392   :  { %2017 = vmatmul.mubr.bf16.vlgmr.msra.gmra.mrb[16].mxu1 %v1744_v25  ;;  %2593 = vmatprep.subr.bf16.mxu0 %v3693_v38  ;;  %v2166_v25 = vld [vmem:[%s5438_s8 + $0x1a0] sm:$0xff] }
 0x393   :  { %3853 = vmatpush3.bf16.msra.mxu1 %v4157_v10  ;;  %2056 = vmatprep.mubr.bf16.mxu1 %v1760_v62  ;;  %v2162_v10 = vld [vmem:[%s5438_s8 + $0x180] sm:$0xff] }
 0x394   :  { %3854 = vmatprep.subr.bf16.mxu1 %v4158_v56  ;;  %2594 = vmatpush1.bf16.msra.mxu0 %v3692_v42  ;;  %v3691_v56 = vcombine.high %v2162_v10, %v2166_v25  ;;  %v3690_v62 = vcombine.low %v2162_v10, %v2166_v25  ;;  %v2124_v42 = vld [vmem:[%s5438_s8 + $0x50] sm:$0xff]  ;;  %v2153_v10 = vld [vmem:[%s5438_s8 + $0x138] sm:$0xff] }
 0x395   :  { %2595 = vmatprep.subr.bf16.mxu0 %v3701_v60  ;;  %v3654_v57 = vcombine.low %v2124_v42, %v2128_v43  ;;  %v3665_v60 = vcombine.high %v2133_v53, %v2137_v55 }
 0x397   :  { %3855 = vmatpush3.bf16.msra.mxu1 %v4159_v13  ;;  %v2170_v13 = vld [vmem:[%s5438_s8 + $0x1c0] sm:$0xff] }
 0x398   :  { %3856 = vmatprep.subr.bf16.mxu1 %v4160_v14  ;;  %2596 = vmatpush1.bf16.msra.mxu0 %v3700_v59  ;;  %v2174_v14 = vld [vmem:[%s5438_s8 + $0x1e0] sm:$0xff] }
 0x39b   :  { %3857 = vmatpush3.bf16.msra.mxu1 %v4161_v17  ;;  %v2116_v17 = vld [vmem:[%s5438_s8 + $0x10] sm:$0xff] }
 0x39c   :  { %3858 = vmatprep.subr.bf16.mxu1 %v4162_v18  ;;  %v3699_v18 = vcombine.high %v2170_v13, %v2174_v14 }
 0x39f   :  { %3859 = vmatpush3.bf16.msra.mxu1 %v4163_v20  ;;  %v2120_v20 = vld [vmem:[%s5438_s8 + $0x30] sm:$0xff] }
 0x3a0   :  { %3860 = vmatprep.subr.bf16.mxu1 %v4164_v21  ;;  %v2117_v21 = vld [vmem:[%s5438_s8 + $0x18] sm:$0xff] }
 0x3a3   :  { %3861 = vmatpush3.bf16.msra.mxu1 %v4165_v52  ;;  %v2121_v52 = vld [vmem:[%s5438_s8 + $0x38] sm:$0xff] }
 0x3a4   :  { %3862 = vmatprep.subr.bf16.mxu1 %v4166_v23  ;;  %v3698_v23 = vcombine.low %v2170_v13, %v2174_v14  ;;  %v2156_v14 = vld [vmem:[%s5438_s8 + $0x150] sm:$0xff] }
 0x3a7   :  { %3863 = vmatpush3.bf16.msra.mxu1 %v4167_v16  ;;  %v3646_v16 = vcombine.low %v2116_v17, %v2120_v20 }
 0x3a8   :  { %3864 = vmatprep.subr.bf16.mxu1 %v4168_v22  ;;  %v3648_v22 = vcombine.low %v2117_v21, %v2121_v52 }
 0x3ab   :  { %3865 = vmatpush3.bf16.msra.mxu1 %v4169_v24  ;;  %v3649_v24 = vcombine.high %v2117_v21, %v2121_v52 }
 0x3ac   :  { %3866 = vmatprep.subr.bf16.mxu1 %v4170_v26  ;;  %v3647_v26 = vcombine.high %v2116_v17, %v2120_v20  ;;  %v2160_v17 = vld [vmem:[%s5438_s8 + $0x170] sm:$0xff]  ;;  %v2161_v20 = vld [vmem:[%s5438_s8 + $0x178] sm:$0xff] }
 0x3ad   :  { %2663 = vmatprep.subr.bf16.mxu0 %v3649_v24  ;;  %v2168_v24 = vld [vmem:[%s5438_s8 + $0x1b0] sm:$0xff] }
 0x3af   :  { %3867 = vmatpush3.bf16.msra.mxu1 %v4171_v27 }
 0x3b0   :  { %3967 = vmatprep.subr.bf16.mxu1 %v4269_v29 }
 0x3b2   :  { %2057 = vmatmul.mubr.bf16.vlgmr.msra.gmra.mrb[20].mxu1 %v1759_v12 }
 0x3b3   :  { %3968 = vmatpush3.bf16.msra.mxu1 %v4172_v28  ;;  %3975 = vmatprep.mubr.msk.bf16.mxu1 %vm4270_vm7, %v4269_v29 }
 0x3b4   :  { %3969 = vmatprep.subr.bf16.mxu1 %v4269_v29 }
 0x3b7   :  { %3970 = vmatpush3.bf16.msra.mxu1 %v4173_v30 }
 0x3b8   :  { %3971 = vmatprep.subr.bf16.mxu1 %v4269_v29 }
 0x3bb   :  { %3972 = vmatpush3.bf16.msra.mxu1 %v4174_v33  ;;  %v3604_v33 = vld [vmem:[%s5437_s7] ss:$0 sm:$0xff] }
 0x3bc   :  { %3973 = vmatprep.subr.bf16.mxu1 %v4269_v29 }
 0x3bf   :  { %3974 = vmatpush3.bf16.msra.mxu1 %v4175_v31 }
 0x3c0   :  { %2540 = vmatprep.subr.bf16.mxu1 %v3643_v41  ;;  %v2110_v41 = vpop.permute.xlu0 %2109 }
 0x3c2   :  { %3976 = vmatmul.mubr.msk.bf16.vlgmr.msra.gmra.mrb[24].mxu1 %vm344_vm0, %v1751_v63  ;;  %vm3405_vm0 = vcmask 41984  }
 0x3c3   :  { %2572 = vmatprep.mubr.bf16.mxu1 %v4264_v1  ;;  %2541 = vmatpush1.bf16.msra.mxu1 %v3642_v40 }
 0x3c4   :  { %2542 = vmatprep.subr.bf16.mxu1 %v3651_v46  ;;  %v3655_v46 = vcombine.high %v2124_v42, %v2128_v43  ;;  %v4182_v42 = vld [vmem:[%s5440_s10 + $0x8] sm:$0xff]  }
 0x3c5   :  { %v4183_v43 = vld [vmem:[%s5440_s10 + $0x88] sm:$0xff]  }
 0x3c7   :  { %2543 = vmatpush1.bf16.msra.mxu1 %v3650_v45  ;;  %v2129_v45 = vld [vmem:[%s5438_s8 + $0x78] sm:$0xff] }
 0x3c8   :  { %2544 = vmatprep.subr.bf16.mxu1 %v3659_v50  ;;  %v3657_v47 = vcombine.high %v2125_v44, %v2129_v45  ;;  %v2136_v50 = vld [vmem:[%s5438_s8 + $0xb0] sm:$0xff] }
 0x3c9   :  { %v3663_v59 = vcombine.high %v2132_v48, %v2136_v50 }
 0x3cb   :  { %2545 = vmatpush1.bf16.msra.mxu1 %v3658_v58  ;;  %v3656_v58 = vcombine.low %v2125_v44, %v2129_v45  ;;  %v4184_v44 = vld [vmem:[%s5440_s10 + $0x50] sm:$0xff]  }
 0x3cc   :  { %2546 = vmatprep.subr.bf16.mxu1 %v3667_v61  ;;  %v2140_v61 = vld [vmem:[%s5438_s8 + $0xd0] sm:$0xff] }
 0x3cd   :  { %v3671_v6 = vcombine.high %v2140_v61, %v2144_v0  ;;  %v3670_v25 = vcombine.low %v2140_v61, %v2144_v0  ;;  %v4185_v45 = vld [vmem:[%s5440_s10 + $0xd0] sm:$0xff]   ;;  %v4197_v61 = vld [vmem:[%s5440_s10 + $0xe8] sm:$0xff]  }
 0x3ce   :  { %v4198_v0 = vld [vmem:[%s5440_s10 + $0x28] sm:$0xff]  }
 0x3cf   :  { %2547 = vmatpush1.bf16.msra.mxu1 %v3666_v49  ;;  %v2145_v49 = vld [vmem:[%s5438_s8 + $0xf8] sm:$0xff] }
 0x3d0   :  { %2548 = vmatprep.subr.bf16.mxu1 %v3675_v3  ;;  %v3662_v3 = vcombine.low %v2132_v48, %v2136_v50  ;;  %v3673_v7 = vcombine.high %v2141_v2, %v2145_v49  ;;  %v4188_v48 = vld [vmem:[%s5440_s10 + $0x58] sm:$0xff]  }
 0x3d1   :  { %v4189_v50 = vld [vmem:[%s5440_s10 + $0xd8] sm:$0xff]  }
 0x3d3   :  { %2549 = vmatpush1.bf16.msra.mxu1 %v3674_v5  ;;  %v3664_v5 = vcombine.low %v2133_v53, %v2137_v55  ;;  %v4191_v53 = vld [vmem:[%s5440_s10 + $0x98] sm:$0xff]   ;;  %v4192_v55 = vld [vmem:[%s5440_s10 + $0x60] sm:$0xff]  }
 0x3d4   :  { %2550 = vmatprep.subr.bf16.mxu1 %v3683_v8  ;;  %v2148_v8 = vld [vmem:[%s5438_s8 + $0x110] sm:$0xff] }
 0x3d7   :  { %2551 = vmatpush1.bf16.msra.mxu1 %v3682_v9  ;;  %v2152_v9 = vld [vmem:[%s5438_s8 + $0x130] sm:$0xff] }
 0x3d8   :  { %2552 = vmatprep.subr.bf16.mxu1 %v3691_v56  ;;  %v3672_v56 = vcombine.low %v2141_v2, %v2145_v49  ;;  %v3678_v21 = vcombine.low %v2148_v8, %v2152_v9  ;;  %v4199_v2 = vld [vmem:[%s5440_s10 + $0xa8] sm:$0xff]   ;;  %v4200_v49 = vld [vmem:[%s5440_s10 + $0x70] sm:$0xff]  }
 0x3db   :  { %2553 = vmatpush1.bf16.msra.mxu1 %v3690_v62  ;;  %v3679_v62 = vcombine.high %v2148_v8, %v2152_v9  ;;  %v4205_v8 = vld [vmem:[%s5440_s10 + $0xf8] sm:$0xff]  }
 0x3dc   :  { %2554 = vmatprep.subr.bf16.mxu1 %v3699_v18  ;;  %v2157_v18 = vld [vmem:[%s5438_s8 + $0x158] sm:$0xff] }
 0x3dd   :  { %v4206_v9 = vld [vmem:[%s5440_s10 + $0x38] sm:$0xff]  }
 0x3df   :  { %2555 = vmatpush1.bf16.msra.mxu1 %v3698_v23  ;;  %v3687_v23 = vcombine.high %v2156_v14, %v2160_v17 }
 0x3e0   :  { %2622 = vmatprep.subr.bf16.mxu1 %v3647_v26  ;;  %v2165_v26 = vld [vmem:[%s5438_s8 + $0x198] sm:$0xff] }
 0x465   :  { %v3846_v27 = vpop.f32.mrb[16].mxu1 }
 0x466   :  { %v3847_v28 = vpop.f32.mrb[17].mxu1 }
 0x467   :  { %v3848_v12 = vadd.f32 %v3847_v28, %v3846_v27  ;;  %v3849_v29 = vpop.f32.mrb[18].mxu1  ;;  %v2169_v27 = vld [vmem:[%s5438_s8 + $0x1b8] sm:$0xff]  ;;  %v3686_v28 = vcombine.low %v2156_v14, %v2160_v17  ;;  %v2186_v14 = vsub.s32 1, %v4883_v4  ;;  %v2194_v17 = vsub.s32 3, %v4883_v4 }
 0x468   :  { %v3850_v30 = vpop.f32.mrb[19].mxu1 }
 0x469   :  { %v2019_v54 = vadd.f32 %v3848_v12, %v3604_v33  ;;  %v3688_v12 = vcombine.low %v2157_v18, %v2161_v20  ;;  %v3697_v30 = vcombine.high %v2165_v26, %v2169_v27  ;;  %v2172_v33 = vld [vmem:[%s5438_s8 + $0x1d0] sm:$0xff] }
 0x485   :  { %v3868_v39 = vpop.f32.mrb[20].mxu1 }
 0x486   :  { %v3869_v31 = vpop.f32.mrb[21].mxu1 }
 0x487   :  { %v3870_v63 = vadd.f32 %v3869_v31, %v3868_v39  ;;  %v3871_v32 = vpop.f32.mrb[22].mxu1  ;;  %v2176_v39 = vld [vmem:[%s5438_s8 + $0x1f0] sm:$0xff]  ;;  %v2173_v31 = vld [vmem:[%s5438_s8 + $0x1d8] sm:$0xff] }
 0x488   :  { %v3872_v34 = vpop.f32.mrb[23].mxu1  ;;  %v3696_v32 = vcombine.low %v2165_v26, %v2169_v27 }
 0x489   :  { %v2059_v11 = vadd.f32 %v3870_v63, %v2019_v54  ;;  %v2177_v54 = vld [vmem:[%s5438_s8 + $0x1f8] sm:$0xff]  ;;  %v3703_v34 = vcombine.high %v2172_v33, %v2176_v39 }
 0x495   :  { %v2098_v19 = vpop.f32.mrb[24].mxu1 }
 0x496   :  { %v2099_v35 = vadd.f32 %v2098_v19, %v2059_v11  ;;  %v3977_v15 = vpop.f32.mrb[25].mxu1  ;;  %v3705_v11 = vcombine.high %v2173_v31, %v2177_v54  ;;  %v3702_v19 = vcombine.low %v2172_v33, %v2176_v39 }
 0x497   :  { %v2101_v36 = vpop.f32.mrb[26].mxu1  ;;  %v4176_v15 = vld [vmem:[%s5440_s10 + $0x40] sm:$0xff]  }
 0x498   :  { %v2104_v37 = vmax.f32 %v2099_v35, 0.0  ;;  %v3978_v38 = vpop.f32.mrb[27].mxu1  ;;  %v3704_v35 = vcombine.low %v2173_v31, %v2177_v54  ;;  %v4177_v36 = vld [vmem:[%s5440_s10 + $0xc0] sm:$0xff]  }
 0x499   :  { %v4179_v38 = vld [vmem:[%s5440_s10 + $0x80] sm:$0xff]  }
 0x49a   :  { %v2105_v40 = vpack.c.bf16 %v2104_v37, %v2104_v37  ;;  %v4178_v37 = vld [vmem:[%s5440_s10] sm:$0xff]  }
 0x49c   :  { %2106 = vst.msk [vmem:[#allocation6] sm:$0x1] %vm1508_vm5, %v2105_v40  ;;  %v4180_v40 = vld [vmem:[%s5440_s10 + $0x48] sm:$0xff]  }
 0x49d   :  { %2112 = vst.msk [vmem:[#allocation6] sm:$0x1] %vm1532_vm6, %v2110_v41  ;;  %v4181_v41 = vld [vmem:[%s5440_s10 + $0xc8] sm:$0xff]  }
 0x4a4   :  { %v5128_v51 = vld [vmem:[#allocation6] sm:$0x1] }
 0x4a5   :  { %2573 = vmatmul.mubr.bf16.vlgmr.msra.gmra.mrb[28].mxu1 %v5128_v51  ;;  %2614 = vmatmul.mubr.bf16.vlgmr.msra.gmra.mrb[72].mxu0 %v5128_v51 }
 0x4a6   :  { %2623 = vmatpush1.bf16.msra.mxu1 %v3646_v16  ;;  %2664 = vmatpush1.bf16.msra.mxu0 %v3648_v22  ;;  %v3689_v16 = vcombine.high %v2157_v18, %v2161_v20  ;;  %v2164_v22 = vld [vmem:[%s5438_s8 + $0x190] sm:$0xff] }
 0x4a7   :  { %2624 = vmatprep.subr.bf16.mxu1 %v3655_v46  ;;  %2665 = vmatprep.subr.bf16.mxu0 %v3657_v47  ;;  %v3695_v29 = vcombine.high %v2164_v22, %v2168_v24  ;;  %v3694_v63 = vcombine.low %v2164_v22, %v2168_v24  ;;  %v4186_v46 = vld [vmem:[%s5440_s10 + $0x10] sm:$0xff]  }
 0x4a8   :  { %2654 = vmatprep.mubr.bf16.mxu1 %v4264_v1  ;;  %2695 = vmatprep.mubr.bf16.mxu0 %v4264_v1  ;;  %v2149_v1 = vld [vmem:[%s5438_s8 + $0x118] sm:$0xff]  ;;  %v4187_v47 = vld [vmem:[%s5440_s10 + $0x90] sm:$0xff]  }
 0x4a9   :  { %v3681_v13 = vcombine.high %v2149_v1, %v2153_v10  ;;  %v3680_v52 = vcombine.low %v2149_v1, %v2153_v10  ;;  %v4207_v1 = vld [vmem:[%s5440_s10 + $0xb8] sm:$0xff]   ;;  %v4208_v10 = vld [vmem:[%s5440_s10 + $0x140] sm:$0xff]  }
 0x4aa   :  { %2625 = vmatpush1.bf16.msra.mxu1 %v3654_v57  ;;  %2666 = vmatpush1.bf16.msra.mxu0 %v3656_v58  ;;  %v4193_v57 = vld [vmem:[%s5440_s10 + $0xe0] sm:$0xff]  }
 0x4ab   :  { %2626 = vmatprep.subr.bf16.mxu1 %v3663_v59  ;;  %2667 = vmatprep.subr.bf16.mxu0 %v3665_v60  ;;  %v4194_v58 = vld [vmem:[%s5440_s10 + $0x20] sm:$0xff]   ;;  %v4196_v60 = vld [vmem:[%s5440_s10 + $0x68] sm:$0xff]  }
 0x4ac   :  { %v4195_v59 = vld [vmem:[%s5440_s10 + $0xa0] sm:$0xff]  }
 0x4ae   :  { %2627 = vmatpush1.bf16.msra.mxu1 %v3662_v3  ;;  %2668 = vmatpush1.bf16.msra.mxu0 %v3664_v5  ;;  %v4201_v3 = vld [vmem:[%s5440_s10 + $0xf0] sm:$0xff]  }
 0x4af   :  { %2628 = vmatprep.subr.bf16.mxu1 %v3671_v6  ;;  %2669 = vmatprep.subr.bf16.mxu0 %v3673_v7  ;;  %v4202_v5 = vld [vmem:[%s5440_s10 + $0x30] sm:$0xff]   ;;  %v4204_v7 = vld [vmem:[%s5440_s10 + $0x78] sm:$0xff]  }
 0x4b0   :  { %v4203_v6 = vld [vmem:[%s5440_s10 + $0xb0] sm:$0xff]  }
 0x4b2   :  { %2629 = vmatpush1.bf16.msra.mxu1 %v3670_v25  ;;  %2670 = vmatpush1.bf16.msra.mxu0 %v3672_v56  ;;  %v4209_v25 = vld [vmem:[%s5440_s10 + $0x1c0] sm:$0xff]   ;;  %v2182_v56 = vsub.s32 0, %v4883_v4 }
 0x4b3   :  { %2630 = vmatprep.subr.bf16.mxu1 %v3679_v62  ;;  %2671 = vmatprep.subr.bf16.mxu0 %v3681_v13  ;;  %v2190_v62 = vsub.s32 2, %v4883_v4  ;;  %v5309_v13 = vld [vmem:[%s5439_s9] sm:$0xff] }
 0x4b4   :  { %v2183_v18 = vrot.slane %v5309_v13, %v2182_v56  ;;  %v4237_v56 = vld [vmem:[%s5440_s10 + $0x1f8] sm:$0xff]  }
 0x4b5   :  { %v2191_v20 = vrot.slane %v5309_v13, %v2190_v62 }
 0x4b6   :  { %2631 = vmatpush1.bf16.msra.mxu1 %v3678_v21  ;;  %2672 = vmatpush1.bf16.msra.mxu0 %v3680_v52  ;;  %v2187_v21 = vrot.slane %v5309_v13, %v2186_v14  ;;  %v2195_v52 = vrot.slane %v5309_v13, %v2194_v17 }
 0x4b7   :  { %2632 = vmatprep.subr.bf16.mxu1 %v3687_v23  ;;  %2673 = vmatprep.subr.bf16.mxu0 %v3689_v16 }
 0x4ba   :  { %2633 = vmatpush1.bf16.msra.mxu1 %v3686_v28  ;;  %2674 = vmatpush1.bf16.msra.mxu0 %v3688_v12 }
 0x4bb   :  { %2634 = vmatprep.subr.bf16.mxu1 %v3695_v29  ;;  %2675 = vmatprep.subr.bf16.mxu0 %v3697_v30 }
 0x4be   :  { %2635 = vmatpush1.bf16.msra.mxu1 %v3694_v63  ;;  %2676 = vmatpush1.bf16.msra.mxu0 %v3696_v32 }
 0x4bf   :  { %2636 = vmatprep.subr.bf16.mxu1 %v3703_v34  ;;  %2677 = vmatprep.subr.bf16.mxu0 %v3705_v11 }
 0x4c2   :  { %2637 = vmatpush1.bf16.msra.mxu1 %v3702_v19  ;;  %2678 = vmatpush1.bf16.msra.mxu0 %v3704_v35  ;;  %v4210_v19 = vld [vmem:[%s5440_s10 + $0x100] sm:$0xff]  }
 0x4c3   :  { %3879 = vmatprep.subr.bf16.mxu1 %v4176_v15  ;;  %3901 = vmatprep.subr.bf16.mxu0 %v4177_v36  ;;  %v4211_v35 = vld [vmem:[%s5440_s10 + $0x180] sm:$0xff]  }
 0x4c5   :  { %2655 = vmatmul.mubr.bf16.vlgmr.msra.gmra.mrb[32].mxu1 %v5128_v51  ;;  %2696 = vmatmul.mubr.bf16.vlgmr.msra.gmra.mrb[76].mxu0 %v5128_v51  ;;  %v4190_v51 = vld [vmem:[%s5440_s10 + $0x18] sm:$0xff]  }
 0x4c6   :  { %3880 = vmatpush3.bf16.msra.mxu1 %v4178_v37  ;;  %3902 = vmatpush3.bf16.msra.mxu0 %v4179_v38  ;;  %v4212_v37 = vld [vmem:[%s5440_s10 + $0x148] sm:$0xff]  }
 0x4c7   :  { %3881 = vmatprep.subr.bf16.mxu1 %v4180_v40  ;;  %3903 = vmatprep.subr.bf16.mxu0 %v4181_v41  ;;  %v4213_v38 = vld [vmem:[%s5440_s10 + $0x1c8] sm:$0xff]  }
 0x4c8   :  { %v4214_v40 = vld [vmem:[%s5440_s10 + $0x108] sm:$0xff]  }
 0x4c9   :  { %v4215_v41 = vld [vmem:[%s5440_s10 + $0x188] sm:$0xff]  }
 0x4ca   :  { %3882 = vmatpush3.bf16.msra.mxu1 %v4182_v42  ;;  %3904 = vmatpush3.bf16.msra.mxu0 %v4183_v43  ;;  %v4216_v42 = vld [vmem:[%s5440_s10 + $0x150] sm:$0xff]  }
 0x4cb   :  { %3883 = vmatprep.subr.bf16.mxu1 %v4184_v44  ;;  %3905 = vmatprep.subr.bf16.mxu0 %v4185_v45  ;;  %v4217_v43 = vld [vmem:[%s5440_s10 + $0x1d0] sm:$0xff]  }
 0x4cc   :  { %v4218_v44 = vld [vmem:[%s5440_s10 + $0x110] sm:$0xff]  }
 0x4cd   :  { %v4219_v45 = vld [vmem:[%s5440_s10 + $0x190] sm:$0xff]  }
 0x4ce   :  { %3884 = vmatpush3.bf16.msra.mxu1 %v4186_v46  ;;  %3906 = vmatpush3.bf16.msra.mxu0 %v4187_v47  ;;  %v4220_v46 = vld [vmem:[%s5440_s10 + $0x158] sm:$0xff]  }
 0x4cf   :  { %3885 = vmatprep.subr.bf16.mxu1 %v4188_v48  ;;  %3907 = vmatprep.subr.bf16.mxu0 %v4189_v50  ;;  %v4221_v47 = vld [vmem:[%s5440_s10 + $0x1d8] sm:$0xff]  }
 0x4d0   :  { %v4222_v48 = vld [vmem:[%s5440_s10 + $0x118] sm:$0xff]  }
 0x4d1   :  { %v4223_v50 = vld [vmem:[%s5440_s10 + $0x198] sm:$0xff]  }
 0x4d2   :  { %3886 = vmatpush3.bf16.msra.mxu1 %v4190_v51  ;;  %3908 = vmatpush3.bf16.msra.mxu0 %v4191_v53  ;;  %v4224_v51 = vld [vmem:[%s5440_s10 + $0x160] sm:$0xff]  }
 0x4d3   :  { %3887 = vmatprep.subr.bf16.mxu1 %v4192_v55  ;;  %3909 = vmatprep.subr.bf16.mxu0 %v4193_v57  ;;  %v4225_v53 = vld [vmem:[%s5440_s10 + $0x1e0] sm:$0xff]  }
 0x4d4   :  { %v4226_v55 = vld [vmem:[%s5440_s10 + $0x120] sm:$0xff]  }
 0x4d5   :  { %v4227_v57 = vld [vmem:[%s5440_s10 + $0x1a0] sm:$0xff]  }
 0x4d6   :  { %3888 = vmatpush3.bf16.msra.mxu1 %v4194_v58  ;;  %3910 = vmatpush3.bf16.msra.mxu0 %v4195_v59  ;;  %v4228_v58 = vld [vmem:[%s5440_s10 + $0x168] sm:$0xff]  }
 0x4d7   :  { %3889 = vmatprep.subr.bf16.mxu1 %v4196_v60  ;;  %3911 = vmatprep.subr.bf16.mxu0 %v4197_v61  ;;  %v4229_v59 = vld [vmem:[%s5440_s10 + $0x1e8] sm:$0xff]   ;;  %v2198_v60 = vsub.s32 4, %v4883_v4  ;;  %v2206_v61 = vsub.s32 6, %v4883_v4 }
 0x4da   :  { %3890 = vmatpush3.bf16.msra.mxu1 %v4198_v0  ;;  %3912 = vmatpush3.bf16.msra.mxu0 %v4199_v2  ;;  %v4230_v0 = vld [vmem:[%s5440_s10 + $0x128] sm:$0xff]  }
 0x4db   :  { %3891 = vmatprep.subr.bf16.mxu1 %v4200_v49  ;;  %3913 = vmatprep.subr.bf16.mxu0 %v4201_v3  ;;  %v4231_v2 = vld [vmem:[%s5440_s10 + $0x1a8] sm:$0xff]   ;;  %v2202_v49 = vsub.s32 5, %v4883_v4  ;;  %v2210_v3 = vsub.s32 7, %v4883_v4 }
 0x4dd   :  { %v2211_v4 = vrot.slane %v5309_v13, %v2210_v3 }
 0x4de   :  { %3892 = vmatpush3.bf16.msra.mxu1 %v4202_v5  ;;  %3914 = vmatpush3.bf16.msra.mxu0 %v4203_v6  ;;  %v4232_v5 = vld [vmem:[%s5440_s10 + $0x170] sm:$0xff]  }
 0x4df   :  { %3893 = vmatprep.subr.bf16.mxu1 %v4204_v7  ;;  %3915 = vmatprep.subr.bf16.mxu0 %v4205_v8  ;;  %v4233_v6 = vld [vmem:[%s5440_s10 + $0x1f0] sm:$0xff]   ;;  %v2199_v7 = vrot.slane %v5309_v13, %v2198_v60  ;;  %v2207_v8 = vrot.slane %v5309_v13, %v2206_v61 }
 0x4e2   :  { %3894 = vmatpush3.bf16.msra.mxu1 %v4206_v9  ;;  %3916 = vmatpush3.bf16.msra.mxu0 %v4207_v1  ;;  %v2203_v9 = vrot.slane %v5309_v13, %v2202_v49  ;;  %v4234_v1 = vld [vmem:[%s5440_s10 + $0x130] sm:$0xff]  }
 0x4e3   :  { %3923 = vmatprep.subr.bf16.mxu1 %v4208_v10  ;;  %3945 = vmatprep.subr.bf16.mxu0 %v4209_v25  ;;  %v4235_v10 = vld [vmem:[%s5440_s10 + $0x1b0] sm:$0xff]   ;;  %v4236_v25 = vld [vmem:[%s5440_s10 + $0x178] sm:$0xff]  }
 0x578   :  { %v2574_v23 = vpop.f32.mrb[28].mxu1  ;;  %v2615_v16 = vpop.f32.mrb[72].mxu0 }
 0x579   :  { %v2575_v22 = vadd.f32 %v2574_v23, %v2183_v18  ;;  %v2616_v24 = vadd.f32 %v2615_v16, %v2191_v20  ;;  %v2576_v26 = vpop.f32.mrb[29].mxu1  ;;  %v2617_v27 = vpop.f32.mrb[73].mxu0 }
 0x57a   :  { %v2577_v28 = vadd.f32 %v2576_v26, %v2187_v21  ;;  %v2618_v12 = vadd.f32 %v2617_v27, %v2195_v52  ;;  %v2578_v29 = vpop.f32.mrb[30].mxu1  ;;  %v2619_v30 = vpop.f32.mrb[74].mxu0 }
 0x57b   :  { %v2704_v33 = vmax.f32 %v2575_v22, 0.0  ;;  %v2706_v39 = vmax.f32 %v2616_v24, 0.0  ;;  %v2579_v31 = vpop.f32.mrb[31].mxu1  ;;  %v2620_v54 = vpop.f32.mrb[75].mxu0  ;;  %v4238_v22 = vld [vmem:[%s5440_s10 + $0x138] sm:$0xff]  }
 0x57c   :  { %v2705_v63 = vmax.f32 %v2577_v28, 0.0  ;;  %v2707_v32 = vmax.f32 %v2618_v12, 0.0  ;;  %v4239_v24 = vld [vmem:[%s5440_s10 + $0x1b8] sm:$0xff]  }
 0x57d   :  { %v2712_v15 = vpack.c.bf16 %v2704_v33, %v2704_v33  ;;  %v2714_v36 = vpack.c.bf16 %v2706_v39, %v2706_v39 }
 0x57e   :  { %v2713_v34 = vpack.c.bf16 %v2705_v63, %v2705_v63  ;;  %v2715_v11 = vpack.c.bf16 %v2707_v32, %v2707_v32  ;;  %v4271_v63 = vmov 6  }
 0x57f   :  { %3988 = vset.pattern.permute.xlu0 %v4271_v63 }
 0x580   :  { %3271 = vmatprep.mubr.bf16.mxu1 %v2713_v34  ;;  %3311 = vmatprep.mubr.bf16.mxu0 %v2715_v11  ;;  %v3706_v11 = vld [vmem:[%s5441_s11] ss:$0 sm:$0xff]  ;;  %s4272_s11 = smov [#allocation7]  }
 0x581   :  { %3272 = vmatmul.mubr.bf16.vlgmr.msra.gmra.mrb[36].mxu1 %v2712_v15  ;;  %3312 = vmatmul.mubr.bf16.vlgmr.msra.gmra.mrb[80].mxu0 %v2714_v36  ;;  %s3419_s2 = sshll.u32 %s4272_s11, 4  ;;  %s3420_s2 = int_to_ptr.vmem [resolvable:$true] %s3419_s2 }
 0x582   :  { %3924 = vmatpush3.bf16.msra.mxu1 %v4210_v19  ;;  %3946 = vmatpush3.bf16.msra.mxu0 %v4211_v35  ;;  %s4240_s18 = scalar_lea.vmem %s3420_s2, 32  ;;  %p4245_p1 = scmp.lt.s32.totalorder %s3420_s2, %s3420_s2 }
 0x583   :  { %3925 = vmatprep.subr.bf16.mxu1 %v4212_v37  ;;  %3947 = vmatprep.subr.bf16.mxu0 %v4213_v38  ;;  %p4241_p0 = scmp.ne.s32.totalorder %s3420_s2, %s4240_s18  ;;  %p4246_p2 = scmp.lt.s32.totalorder %s4240_s18, %s4240_s18 }
 0x585   :  { %p4247_p3 = por %p4246_p2, %p4245_p1 }
 0x586   :  { %3926 = vmatpush3.bf16.msra.mxu1 %v4214_v40  ;;  %3948 = vmatpush3.bf16.msra.mxu0 %v4215_v41 }
 0x587   :  { %3927 = vmatprep.subr.bf16.mxu1 %v4216_v42  ;;  %3949 = vmatprep.subr.bf16.mxu0 %v4217_v43  ;;  %p4248_p4 = pnand %p4247_p3, %p4241_p0 }
 0x58a   :  { %3928 = vmatpush3.bf16.msra.mxu1 %v4218_v44  ;;  %3950 = vmatpush3.bf16.msra.mxu0 %v4219_v45 }
 0x58b   :  { %3929 = vmatprep.subr.bf16.mxu1 %v4220_v46  ;;  %3951 = vmatprep.subr.bf16.mxu0 %v4221_v47 }
 0x58e   :  { %3930 = vmatpush3.bf16.msra.mxu1 %v4222_v48  ;;  %3952 = vmatpush3.bf16.msra.mxu0 %v4223_v50 }
 0x58f   :  { %3931 = vmatprep.subr.bf16.mxu1 %v4224_v51  ;;  %3953 = vmatprep.subr.bf16.mxu0 %v4225_v53 }
 0x592   :  { %3932 = vmatpush3.bf16.msra.mxu1 %v4226_v55  ;;  %3954 = vmatpush3.bf16.msra.mxu0 %v4227_v57 }
 0x593   :  { %3933 = vmatprep.subr.bf16.mxu1 %v4228_v58  ;;  %3955 = vmatprep.subr.bf16.mxu0 %v4229_v59 }
 0x596   :  { %3934 = vmatpush3.bf16.msra.mxu1 %v4230_v0  ;;  %3956 = vmatpush3.bf16.msra.mxu0 %v4231_v2 }
 0x597   :  { %3935 = vmatprep.subr.bf16.mxu1 %v4232_v5  ;;  %3957 = vmatprep.subr.bf16.mxu0 %v4233_v6 }
 0x598   :  { %v2656_v62 = vpop.f32.mrb[32].mxu1  ;;  %v2697_v13 = vpop.f32.mrb[76].mxu0 }
 0x599   :  { %v2657_v14 = vadd.f32 %v2656_v62, %v2199_v7  ;;  %v2698_v17 = vadd.f32 %v2697_v13, %v2207_v8  ;;  %v2658_v18 = vpop.f32.mrb[33].mxu1  ;;  %v2699_v20 = vpop.f32.mrb[77].mxu0 }
 0x59a   :  { %v2659_v21 = vadd.f32 %v2658_v18, %v2203_v9  ;;  %v2700_v52 = vadd.f32 %v2699_v20, %v2211_v4  ;;  %v2660_v23 = vpop.f32.mrb[34].mxu1  ;;  %v2701_v16 = vpop.f32.mrb[78].mxu0  ;;  %3936 = vmatpush3.bf16.msra.mxu1 %v4234_v1  ;;  %3958 = vmatpush3.bf16.msra.mxu0 %v4235_v10 }
 0x59b   :  { %v2708_v26 = vmax.f32 %v2657_v14, 0.0  ;;  %v2710_v27 = vmax.f32 %v2698_v17, 0.0  ;;  %v2661_v28 = vpop.f32.mrb[35].mxu1  ;;  %v2702_v12 = vpop.f32.mrb[79].mxu0  ;;  %3937 = vmatprep.subr.bf16.mxu1 %v4236_v25  ;;  %3959 = vmatprep.subr.bf16.mxu0 %v4237_v56 }
 0x59c   :  { %v2709_v29 = vmax.f32 %v2659_v21, 0.0  ;;  %v2711_v30 = vmax.f32 %v2700_v52, 0.0 }
 0x59d   :  { %v2716_v31 = vpack.c.bf16 %v2708_v26, %v2708_v26  ;;  %v2718_v54 = vpack.c.bf16 %v2710_v27, %v2710_v27 }
 0x59e   :  { %v2717_v33 = vpack.c.bf16 %v2709_v29, %v2709_v29  ;;  %v2719_v39 = vpack.c.bf16 %v2711_v30, %v2711_v30  ;;  %3938 = vmatpush3.bf16.msra.mxu1 %v4238_v22  ;;  %3960 = vmatpush3.bf16.msra.mxu0 %v4239_v24 }
 0x5a0   :  { %3351 = vmatprep.mubr.bf16.mxu1 %v2717_v33  ;;  %3391 = vmatprep.mubr.bf16.mxu0 %v2719_v39 }
 0x5a1   :  { %3352 = vmatmul.mubr.bf16.vlgmr.msra.gmra.mrb[40].mxu1 %v2716_v31  ;;  %3392 = vmatmul.mubr.bf16.vlgmr.msra.gmra.mrb[84].mxu0 %v2718_v54 }
 0x654   :  { %v3895_v32 = vpop.f32.mrb[36].mxu1  ;;  %v3917_v34 = vpop.f32.mrb[80].mxu0 }
 0x655   :  { %v3896_v19 = vpop.f32.mrb[37].mxu1  ;;  %v3918_v35 = vpop.f32.mrb[81].mxu0 }
 0x656   :  { %v3897_v15 = vadd.f32 %v3896_v19, %v3895_v32  ;;  %v3919_v36 = vadd.f32 %v3918_v35, %v3917_v34  ;;  %v3898_v37 = vpop.f32.mrb[38].mxu1  ;;  %v3920_v38 = vpop.f32.mrb[82].mxu0 }
 0x657   :  { %v3899_v40 = vpop.f32.mrb[39].mxu1  ;;  %v3921_v41 = vpop.f32.mrb[83].mxu0 }
 0x658   :  { %v3274_v42 = vadd.f32 %v3897_v15, %v3706_v11 }
 0x65a   :  { %v3314_v43 = vadd.f32 %v3919_v36, %v3274_v42 }
 0x674   :  { %v3939_v44 = vpop.f32.mrb[40].mxu1  ;;  %v3961_v45 = vpop.f32.mrb[84].mxu0 }
 0x675   :  { %v3940_v46 = vpop.f32.mrb[41].mxu1  ;;  %v3962_v47 = vpop.f32.mrb[85].mxu0 }
 0x676   :  { %v3941_v48 = vadd.f32 %v3940_v46, %v3939_v44  ;;  %v3963_v50 = vadd.f32 %v3962_v47, %v3961_v45  ;;  %v3942_v51 = vpop.f32.mrb[42].mxu1  ;;  %v3964_v53 = vpop.f32.mrb[86].mxu0 }
 0x677   :  { %v3943_v55 = vpop.f32.mrb[43].mxu1  ;;  %v3965_v57 = vpop.f32.mrb[87].mxu0 }
 0x678   :  { %v3354_v58 = vadd.f32 %v3941_v48, %v3314_v43 }
 0x67a   :  { %v3394_v59 = vadd.f32 %v3963_v50, %v3354_v58 }
 0x67c   :  { %3401 = vperm.xlu0 %3988, %v3394_v59   ;;  %v3406_v60 = vsel %vm3405_vm0, %v3394_v59, 0.0 }
 0x67d   :  { %3407 = vadd.xlane.f32.xlu1 %v3406_v60 }
 0x6fb   :  { %v3402_v61 = vpop.permute.xlu0 %3401 }
 0x6fc   :  { %v3404_v2 = vadd.f32 %v3402_v61, %v3394_v59 }
 0x70a   :  { %v3408_v0 = vpop.xlane.xlu1 %3407 }
 0x70b   :  { %v3410_v49 = vmul.f32 0.16666667, %v3408_v0 }
 0x70d   :  { %v3411_v3 = vsub.f32 %v3404_v2, %v3410_v49 }
 0x70f   :  { %3412 = vst.msk [vmem:[#allocation7] sm:$0x3] %vm3405_vm0, %v3411_v3 }
 0x710   :  { %4251 = shalt.err (!%p4248_p4)
}
 0x711   :  { %s4252_s1 = scalar_lea.hbm %s5442_s12, 32 }
 0x712   :  { %p4253_p5 = scmp.ne.s32.totalorder %s5442_s12, %s4252_s1  ;;  %p4256_p6 = scmp.lt.u32.totalorder %s4252_s1, %s5442_s12 }
 0x714   :  { %p4258_p7 = pnand %p4256_p6, %p4253_p5 }
 0x716   :  { %4261 = shalt.err (!%p4258_p7)
}
 0x717   :  { %3422 = dma.vmem_to_hbm [thread:$0]  %s3420_s2, 32, %s5442_s12, [#allocation8]  }
 0x718   :  { %4262 = dma.done.wait [#allocation8], 32  }
 0x719   :  { %4263 = vsyncadd [#allocation8], 4294967264 }
 0x71a   :  { %3426 = vsyncpa [#allocation8], 1 }

</bundles_post_ra>
